<compile_context>
chip_gen: v7x
topology: tpu7x:2x2x1
jax: 0.10.0
libtpu: 0.0.40
codegen_flags: <defaults>
</compile_context>

<pallas_src>
import functools

import jax
import jax.numpy as jnp
from jax import lax
from jax.experimental import pallas as pl
from jax.experimental.pallas import tpu as pltpu  # noqa: F401  (TPU backend)

# ---- tiny model config ----------------------------------------------------
VOCAB = 256
HIDDEN = 128
N_LAYERS = 2
N_HEADS = 1                  # single head, head_dim = 128 (lane-aligned)
HEAD_DIM = HIDDEN // N_HEADS
INTER = 256
RMS_EPS = 1e-6
ROPE_THETA = 10000.0
DTYPE = jnp.bfloat16


# ---- in-kernel helpers (pure jnp/lax, traced inside the Pallas kernels) ----

def _rms_normalize(x_f32, w_ref_val):
    # x_f32: (M, D) float32, w_ref_val: (1, D)
    var = jnp.mean(x_f32 * x_f32, axis=-1, keepdims=True)
    return x_f32 * lax.rsqrt(var + RMS_EPS) * w_ref_val.astype(jnp.float32)


def _rotate_half(x):
    # rotate_half(x) = concat(-x2, x1); x: (M, D) float32
    half = x.shape[-1] // 2
    return jnp.concatenate([-x[:, half:], x[:, :half]], axis=-1)


# ---- fused decoder-layer kernel --------------------------------------------

def _decoder_layer_kernel(h_ref, cos_ref, sin_ref, ln1_ref, wqkv_ref, bqkv_ref,
                          wo_ref, ln2_ref, wgu_ref, wdown_ref, o_ref,
                          *, batch, seq):
    d = h_ref.shape[-1]
    inter = wdown_ref.shape[0]

    h = h_ref[...].astype(jnp.float32)                         # (M, D) residual

    # -- RMSNorm(ln1) fused into the QKV matmul (bf16 MXU, f32 accumulate) --
    xn = _rms_normalize(h, ln1_ref[...]).astype(jnp.bfloat16)
    qkv = jnp.dot(xn, wqkv_ref[...], preferred_element_type=jnp.float32)
    qkv = qkv + bqkv_ref[...].astype(jnp.float32)              # (M, 3D)

    cos = cos_ref[...]                                         # (M, D) f32
    sin = sin_ref[...]
    scale = 1.0 / (float(d) ** 0.5)

    q = qkv[:, :d]
    k = qkv[:, d:2 * d]
    v = qkv[:, 2 * d:3 * d]
    # RoPE in f32, then cast operands to bf16 for the MXU.
    q = ((q * cos + _rotate_half(q) * sin) * scale).astype(jnp.bfloat16)
    k = (k * cos + _rotate_half(k) * sin).astype(jnp.bfloat16)
    v = v.astype(jnp.bfloat16)

    # -- causal self-attention, all rows resident in VMEM -------------------
    row = lax.broadcasted_iota(jnp.int32, (seq, seq), 0)
    col = lax.broadcasted_iota(jnp.int32, (seq, seq), 1)
    causal = col <= row

    attn_rows = []
    for b in range(batch):                                     # static (B small)
        lo, hi = b * seq, (b + 1) * seq
        qb, kb, vb = q[lo:hi, :], k[lo:hi, :], v[lo:hi, :]
        # q @ k^T via dot_general contracting last dims (no transpose pass).
        s = lax.dot_general(qb, kb, (((1,), (1,)), ((), ())),
                            preferred_element_type=jnp.float32)
        s = jnp.where(causal, s, -jnp.inf)
        s = s - jnp.max(s, axis=-1, keepdims=True)
        p = jnp.exp(s)
        p = p * pl.reciprocal(jnp.sum(p, axis=-1, keepdims=True), approx=True)
        attn_rows.append(jnp.dot(p.astype(jnp.bfloat16), vb,
                                 preferred_element_type=jnp.float32))
    attn = jnp.concatenate(attn_rows, axis=0)                  # (M, D) f32

    # -- output projection with residual fused into the epilogue ------------
    h = h + jnp.dot(attn.astype(jnp.bfloat16), wo_ref[...],
                    preferred_element_type=jnp.float32)

    # -- RMSNorm(ln2) fused into gate|up matmul, SwiGLU, down + residual -----
    xn2 = _rms_normalize(h, ln2_ref[...]).astype(jnp.bfloat16)
    gu = jnp.dot(xn2, wgu_ref[...], preferred_element_type=jnp.float32)
    g = gu[:, :inter]
    u = gu[:, inter:]
    act = (g * jax.nn.sigmoid(g) * u).astype(jnp.bfloat16)
    h = h + jnp.dot(act, wdown_ref[...], preferred_element_type=jnp.float32)

    o_ref[...] = h.astype(o_ref.dtype)


def decoder_layer(h2d, layer, cos_t, sin_t, batch, seq):
    m, d = h2d.shape
    kernel = functools.partial(_decoder_layer_kernel, batch=batch, seq=seq)
    return pl.pallas_call(
        kernel,
        out_shape=jax.ShapeDtypeStruct((m, d), h2d.dtype),
    )(h2d, cos_t, sin_t,
      layer["ln1"], layer["wqkv"], layer["bqkv"],
      layer["wo"], layer["ln2"], layer["wgu"], layer["wdown"])


# ---- fused final-norm + lm_head kernel --------------------------------------

def _lm_head_kernel(h_ref, wn_ref, wl_ref, o_ref):
    x = h_ref[...].astype(jnp.float32)
    xn = _rms_normalize(x, wn_ref[...]).astype(jnp.bfloat16)
    o_ref[...] = jnp.dot(xn, wl_ref[...],
                         preferred_element_type=jnp.float32).astype(o_ref.dtype)


def lm_head(h2d, w_norm, w_lm):
    m = h2d.shape[0]
    v = w_lm.shape[1]
    return pl.pallas_call(
        _lm_head_kernel,
        out_shape=jax.ShapeDtypeStruct((m, v), h2d.dtype),
    )(h2d, w_norm, w_lm)


# ---- parameter init (deterministic, synthetic) ------------------------------
# TODO(synk): pretrained-checkpoint loading (AutoModelForCausalLM.from_pretrained),
# quantization_config and PEFT/LoRA wrapping have no Pallas equivalent; weights
# are synthetic and deterministic instead.

def init_params(key):
    keys = jax.random.split(key, 2 + N_LAYERS)

    def nrm(k, shape, scale=0.02):
        return (jax.random.normal(k, shape, jnp.float32) * scale).astype(DTYPE)

    params = {
        "embed": nrm(keys[0], (VOCAB, HIDDEN)),
        "lm_head": nrm(keys[1], (HIDDEN, VOCAB)),
        "final_norm": jnp.ones((1, HIDDEN), DTYPE),
        "layers": [],
    }
    for i in range(N_LAYERS):
        lk = jax.random.split(keys[2 + i], 5)
        params["layers"].append({
            "ln1": jnp.ones((1, HIDDEN), DTYPE),
            # Wq|Wk|Wv pre-concatenated -> single wide matmul in the kernel.
            "wqkv": nrm(lk[0], (HIDDEN, 3 * HIDDEN)),
            "bqkv": nrm(lk[1], (1, 3 * HIDDEN)),
            "wo": nrm(lk[2], (HIDDEN, HIDDEN)),
            "ln2": jnp.ones((1, HIDDEN), DTYPE),
            # Wgate|Wup pre-concatenated.
            "wgu": nrm(lk[3], (HIDDEN, 2 * INTER)),
            "wdown": nrm(lk[4], (INTER, HIDDEN)),
        })
    return params


def rope_tables(batch, seq, dim):
    inv_freq = 1.0 / (
        ROPE_THETA ** (jnp.arange(0, dim, 2, dtype=jnp.float32) / dim)
    )
    pos = jnp.arange(seq, dtype=jnp.float32)
    freqs = pos[:, None] * inv_freq[None, :]
    emb = jnp.concatenate([freqs, freqs], axis=-1)        # (S, dim)
    cos = jnp.cos(emb)
    sin = jnp.sin(emb)
    # Tile across batch so tables line up row-for-row with the (B*S, D) stream.
    return jnp.tile(cos, (batch, 1)), jnp.tile(sin, (batch, 1))


# ---- forward pass ------------------------------------------------------------
# NOTE: N_HEADS == 1 so full-width (128) RoPE/attention is exact; >1 heads would
# need per-head splitting inside the layer kernel.

def forward(params, input_ids):
    # input_ids: (B, S) int32 -> logits (B, S, VOCAB)
    b, s = input_ids.shape
    # token embedding gather kept as XLA glue (pure memory op)
    h = jnp.take(params["embed"], input_ids.reshape(-1), axis=0)   # (B*S, D)
    cos_t, sin_t = rope_tables(b, s, HEAD_DIM)

    for layer in params["layers"]:
        h = decoder_layer(h, layer, cos_t, sin_t, b, s)

    logits = lm_head(h, params["final_norm"], params["lm_head"])
    return logits.reshape(b, s, VOCAB)


# TODO(synk): the CLTechniques machinery (EWC/A-GEM/LwF/MAS regularizers) is
# training-time bookkeeping around backward passes and has no forward-pass
# Pallas equivalent; only the wrapped model forward is implemented.

if __name__ == "__main__":
    key = jax.random.PRNGKey(0)
    pkey, dkey = jax.random.split(key)
    params = init_params(pkey)

    B, S = 2, 8
    input_ids = jax.random.randint(dkey, (B, S), 0, VOCAB, dtype=jnp.int32)

    logits = jax.jit(forward)(params, input_ids)
    logits = jax.block_until_ready(logits)

    assert logits.shape == (B, S, VOCAB), logits.shape
    assert bool(jnp.all(jnp.isfinite(logits.astype(jnp.float32))))
    print("KERNEL_OK")
</pallas_src>

<mosaic_0001>
module attributes {stable_mosaic.version = 11 : i64} {
  func.func @_lm_head_kernel(%arg0: memref<16x128xbf16, #tpu.memory_space<vmem>>, %arg1: memref<1x128xbf16, #tpu.memory_space<vmem>>, %arg2: memref<128x256xbf16, #tpu.memory_space<vmem>>, %arg3: memref<16x256xbf16, #tpu.memory_space<vmem>>) attributes {dimension_semantics = [], scalar_prefetch = 0 : i64, scratch_operands = 0 : i64, tpu.core_type = #tpu.core_type<tc>} {
    %c0 = arith.constant 0 : index
    %c0_0 = arith.constant 0 : index
    %0 = vector.load %arg0[%c0, %c0_0] : memref<16x128xbf16, #tpu.memory_space<vmem>>, vector<16x128xbf16>
    %1 = arith.extf %0 : vector<16x128xbf16> to vector<16x128xf32>
    %c0_1 = arith.constant 0 : index
    %c0_2 = arith.constant 0 : index
    %2 = vector.load %arg1[%c0_1, %c0_2] : memref<1x128xbf16, #tpu.memory_space<vmem>>, vector<1x128xbf16>
    %3 = arith.mulf %1, %1 : vector<16x128xf32>
    %cst = arith.constant dense<0.000000e+00> : vector<16xf32>
    %4 = vector.multi_reduction <add>, %3, %cst [1] : vector<16x128xf32> to vector<16xf32>
    %5 = vector.shape_cast %4 : vector<16xf32> to vector<16x1xf32>
    %cst_3 = arith.constant 1.280000e+02 : f32
    %6 = vector.broadcast %cst_3 : f32 to vector<16x1xf32>
    %7 = arith.divf %5, %6 : vector<16x1xf32>
    %cst_4 = arith.constant 9.99999997E-7 : f32
    %8 = vector.broadcast %cst_4 : f32 to vector<16x1xf32>
    %9 = arith.addf %7, %8 : vector<16x1xf32>
    %10 = math.rsqrt %9 : vector<16x1xf32>
    %11 = vector.broadcast %10 : vector<16x1xf32> to vector<16x128xf32>
    %12 = arith.mulf %1, %11 : vector<16x128xf32>
    %13 = arith.extf %2 : vector<1x128xbf16> to vector<1x128xf32>
    %14 = vector.broadcast %13 : vector<1x128xf32> to vector<16x128xf32>
    %15 = arith.mulf %12, %14 : vector<16x128xf32>
    %16 = arith.truncf %15 : vector<16x128xf32> to vector<16x128xbf16>
    %c0_5 = arith.constant 0 : index
    %c0_6 = arith.constant 0 : index
    %17 = vector.load %arg2[%c0_5, %c0_6] : memref<128x256xbf16, #tpu.memory_space<vmem>>, vector<128x256xbf16>
    %cst_7 = arith.constant dense<0.000000e+00> : vector<16x256xf32>
    %18 = tpu.matmul %16, %17, %cst_7 {dimension_numbers = #tpu.dot_dimension_numbers<[1], [0], [0], [1], [0, 0, 1, 1], [], []>} : vector<16x128xbf16>, vector<128x256xbf16>, vector<16x256xf32> -> vector<16x256xf32>
    %19 = arith.truncf %18 : vector<16x256xf32> to vector<16x256xbf16>
    %c0_8 = arith.constant 0 : index
    %c0_9 = arith.constant 0 : index
    %20 = vector.load %arg3[%c0_8, %c0_9] : memref<16x256xbf16, #tpu.memory_space<vmem>>, vector<16x256xbf16>
    tpu.vector_store %arg3[%c0_8, %c0_9], %19 {strides = array<i32>} : memref<16x256xbf16, #tpu.memory_space<vmem>>, vector<16x256xbf16>,
    return
  }
}

module attributes {stable_mosaic.version = 11 : i64} {
  func.func @_decoder_layer_kernel(%arg0: memref<16x128xbf16, #tpu.memory_space<vmem>>, %arg1: memref<16x128xf32, #tpu.memory_space<vmem>>, %arg2: memref<16x128xf32, #tpu.memory_space<vmem>>, %arg3: memref<1x128xbf16, #tpu.memory_space<vmem>>, %arg4: memref<128x384xbf16, #tpu.memory_space<vmem>>, %arg5: memref<1x384xbf16, #tpu.memory_space<vmem>>, %arg6: memref<128x128xbf16, #tpu.memory_space<vmem>>, %arg7: memref<1x128xbf16, #tpu.memory_space<vmem>>, %arg8: memref<128x512xbf16, #tpu.memory_space<vmem>>, %arg9: memref<256x128xbf16, #tpu.memory_space<vmem>>, %arg10: memref<16x128xbf16, #tpu.memory_space<vmem>>) attributes {dimension_semantics = [], scalar_prefetch = 0 : i64, scratch_operands = 0 : i64, tpu.core_type = #tpu.core_type<tc>} {
    %c0 = arith.constant 0 : index
    %c0_0 = arith.constant 0 : index
    %0 = vector.load %arg0[%c0, %c0_0] : memref<16x128xbf16, #tpu.memory_space<vmem>>, vector<16x128xbf16>
    %1 = arith.extf %0 : vector<16x128xbf16> to vector<16x128xf32>
    %c0_1 = arith.constant 0 : index
    %c0_2 = arith.constant 0 : index
    %2 = vector.load %arg3[%c0_1, %c0_2] : memref<1x128xbf16, #tpu.memory_space<vmem>>, vector<1x128xbf16>
    %3 = arith.mulf %1, %1 : vector<16x128xf32>
    %cst = arith.constant dense<0.000000e+00> : vector<16xf32>
    %4 = vector.multi_reduction <add>, %3, %cst [1] : vector<16x128xf32> to vector<16xf32>
    %5 = vector.shape_cast %4 : vector<16xf32> to vector<16x1xf32>
    %cst_3 = arith.constant 1.280000e+02 : f32
    %6 = vector.broadcast %cst_3 : f32 to vector<16x1xf32>
    %7 = arith.divf %5, %6 : vector<16x1xf32>
    %cst_4 = arith.constant 9.99999997E-7 : f32
    %8 = vector.broadcast %cst_4 : f32 to vector<16x1xf32>
    %9 = arith.addf %7, %8 : vector<16x1xf32>
    %10 = math.rsqrt %9 : vector<16x1xf32>
    %11 = vector.broadcast %10 : vector<16x1xf32> to vector<16x128xf32>
    %12 = arith.mulf %1, %11 : vector<16x128xf32>
    %13 = arith.extf %2 : vector<1x128xbf16> to vector<1x128xf32>
    %14 = vector.broadcast %13 : vector<1x128xf32> to vector<16x128xf32>
    %15 = arith.mulf %12, %14 : vector<16x128xf32>
    %16 = arith.truncf %15 : vector<16x128xf32> to vector<16x128xbf16>
    %c0_5 = arith.constant 0 : index
    %c0_6 = arith.constant 0 : index
    %17 = vector.load %arg4[%c0_5, %c0_6] : memref<128x384xbf16, #tpu.memory_space<vmem>>, vector<128x384xbf16>
    %cst_7 = arith.constant dense<0.000000e+00> : vector<16x384xf32>
    %18 = tpu.matmul %16, %17, %cst_7 {dimension_numbers = #tpu.dot_dimension_numbers<[1], [0], [0], [1], [0, 0, 1, 1], [], []>} : vector<16x128xbf16>, vector<128x384xbf16>, vector<16x384xf32> -> vector<16x384xf32>
    %c0_8 = arith.constant 0 : index
    %c0_9 = arith.constant 0 : index
    %19 = vector.load %arg5[%c0_8, %c0_9] : memref<1x384xbf16, #tpu.memory_space<vmem>>, vector<1x384xbf16>
    %20 = arith.extf %19 : vector<1x384xbf16> to vector<1x384xf32>
    %21 = vector.broadcast %20 : vector<1x384xf32> to vector<16x384xf32>
    %22 = arith.addf %18, %21 : vector<16x384xf32>
    %c0_10 = arith.constant 0 : index
    %c0_11 = arith.constant 0 : index
    %23 = vector.load %arg1[%c0_10, %c0_11] : memref<16x128xf32, #tpu.memory_space<vmem>>, vector<16x128xf32>
    %c0_12 = arith.constant 0 : index
    %c0_13 = arith.constant 0 : index
    %24 = vector.load %arg2[%c0_12, %c0_13] : memref<16x128xf32, #tpu.memory_space<vmem>>, vector<16x128xf32>
    %25 = vector.extract_strided_slice %22 {offsets = [0, 0], sizes = [16, 128], strides = [1, 1]} : vector<16x384xf32> to vector<16x128xf32>
    %26 = vector.extract_strided_slice %22 {offsets = [0, 128], sizes = [16, 128], strides = [1, 1]} : vector<16x384xf32> to vector<16x128xf32>
    %27 = vector.extract_strided_slice %22 {offsets = [0, 256], sizes = [16, 128], strides = [1, 1]} : vector<16x384xf32> to vector<16x128xf32>
    %28 = arith.mulf %25, %23 : vector<16x128xf32>
    %29 = vector.extract_strided_slice %25 {offsets = [0, 64], sizes = [16, 64], strides = [1, 1]} : vector<16x128xf32> to vector<16x64xf32>
    %cst_14 = arith.constant 0.000000e+00 : f32
    %30 = vector.broadcast %cst_14 : f32 to vector<16x64xf32>
    %31 = arith.subf %30, %29 : vector<16x64xf32>
    %32 = vector.extract_strided_slice %25 {offsets = [0, 0], sizes = [16, 64], strides = [1, 1]} : vector<16x128xf32> to vector<16x64xf32>
    %33 = tpu.concatenate %31, %32 in 1 : vector<16x64xf32>, vector<16x64xf32> -> vector<16x128xf32>
    %34 = arith.mulf %33, %24 : vector<16x128xf32>
    %35 = arith.addf %28, %34 : vector<16x128xf32>
    %cst_15 = arith.constant 0.0883883461 : f32
    %36 = vector.broadcast %cst_15 : f32 to vector<16x128xf32>
    %37 = arith.mulf %35, %36 : vector<16x128xf32>
    %38 = arith.truncf %37 : vector<16x128xf32> to vector<16x128xbf16>
    %39 = arith.mulf %26, %23 : vector<16x128xf32>
    %40 = vector.extract_strided_slice %26 {offsets = [0, 64], sizes = [16, 64], strides = [1, 1]} : vector<16x128xf32> to vector<16x64xf32>
    %cst_16 = arith.constant 0.000000e+00 : f32
    %41 = vector.broadcast %cst_16 : f32 to vector<16x64xf32>
    %42 = arith.subf %41, %40 : vector<16x64xf32>
    %43 = vector.extract_strided_slice %26 {offsets = [0, 0], sizes = [16, 64], strides = [1, 1]} : vector<16x128xf32> to vector<16x64xf32>
    %44 = tpu.concatenate %42, %43 in 1 : vector<16x64xf32>, vector<16x64xf32> -> vector<16x128xf32>
    %45 = arith.mulf %44, %24 : vector<16x128xf32>
    %46 = arith.addf %39, %45 : vector<16x128xf32>
    %47 = arith.truncf %46 : vector<16x128xf32> to vector<16x128xbf16>
    %48 = arith.truncf %27 : vector<16x128xf32> to vector<16x128xbf16>
    %49 = tpu.iota {dimensions = array<i32: 0>} : vector<8x8xi32>
    %50 = tpu.iota {dimensions = array<i32: 1>} : vector<8x8xi32>
    %51 = arith.cmpi sle, %50, %49 : vector<8x8xi32>
    %52 = vector.extract_strided_slice %38 {offsets = [0, 0], sizes = [8, 128], strides = [1, 1]} : vector<16x128xbf16> to vector<8x128xbf16>
    %53 = vector.extract_strided_slice %47 {offsets = [0, 0], sizes = [8, 128], strides = [1, 1]} : vector<16x128xbf16> to vector<8x128xbf16>
    %54 = vector.extract_strided_slice %48 {offsets = [0, 0], sizes = [8, 128], strides = [1, 1]} : vector<16x128xbf16> to vector<8x128xbf16>
    %cst_17 = arith.constant dense<0.000000e+00> : vector<8x8xf32>
    %55 = tpu.matmul %52, %53, %cst_17 {dimension_numbers = #tpu.dot_dimension_numbers<[1], [1], [0], [0], [0, 0, 1, 0], [], []>} : vector<8x128xbf16>, vector<8x128xbf16>, vector<8x8xf32> -> vector<8x8xf32>
    %cst_18 = arith.constant 0xFF800000 : f32
    %56 = vector.broadcast %cst_18 : f32 to vector<8x8xf32>
    %57 = arith.select %51, %55, %56 : vector<8x8xi1>, vector<8x8xf32>
    %cst_19 = arith.constant dense<0xFF800000> : vector<8xf32>
    %58 = vector.multi_reduction <maximumf>, %57, %cst_19 [1] : vector<8x8xf32> to vector<8xf32>
    %59 = vector.shape_cast %58 : vector<8xf32> to vector<8x1xf32>
    %60 = vector.broadcast %59 : vector<8x1xf32> to vector<8x8xf32>
    %61 = arith.subf %57, %60 : vector<8x8xf32>
    %62 = math.exp %61 : vector<8x8xf32>
    %cst_20 = arith.constant dense<0.000000e+00> : vector<8xf32>
    %63 = vector.multi_reduction <add>, %62, %cst_20 [1] : vector<8x8xf32> to vector<8xf32>
    %64 = vector.shape_cast %63 : vector<8xf32> to vector<8x1xf32>
    %65 = tpu.reciprocal %64 {approx = true} : vector<8x1xf32> -> vector<8x1xf32>
    %66 = vector.broadcast %65 : vector<8x1xf32> to vector<8x8xf32>
    %67 = arith.mulf %62, %66 : vector<8x8xf32>
    %68 = arith.truncf %67 : vector<8x8xf32> to vector<8x8xbf16>
    %cst_21 = arith.constant dense<0.000000e+00> : vector<8x128xf32>
    %69 = tpu.matmul %68, %54, %cst_21 {dimension_numbers = #tpu.dot_dimension_numbers<[1], [0], [0], [1], [0, 0, 1, 1], [], []>} : vector<8x8xbf16>, vector<8x128xbf16>, vector<8x128xf32> -> vector<8x128xf32>
    %70 = vector.extract_strided_slice %38 {offsets = [8, 0], sizes = [8, 128], strides = [1, 1]} : vector<16x128xbf16> to vector<8x128xbf16>
    %71 = vector.extract_strided_slice %47 {offsets = [8, 0], sizes = [8, 128], strides = [1, 1]} : vector<16x128xbf16> to vector<8x128xbf16>
    %72 = vector.extract_strided_slice %48 {offsets = [8, 0], sizes = [8, 128], strides = [1, 1]} : vector<16x128xbf16> to vector<8x128xbf16>
    %cst_22 = arith.constant dense<0.000000e+00> : vector<8x8xf32>
    %73 = tpu.matmul %70, %71, %cst_22 {dimension_numbers = #tpu.dot_dimension_numbers<[1], [1], [0], [0], [0, 0, 1, 0], [], []>} : vector<8x128xbf16>, vector<8x128xbf16>, vector<8x8xf32> -> vector<8x8xf32>
    %cst_23 = arith.constant 0xFF800000 : f32
    %74 = vector.broadcast %cst_23 : f32 to vector<8x8xf32>
    %75 = arith.select %51, %73, %74 : vector<8x8xi1>, vector<8x8xf32>
    %cst_24 = arith.constant dense<0xFF800000> : vector<8xf32>
    %76 = vector.multi_reduction <maximumf>, %75, %cst_24 [1] : vector<8x8xf32> to vector<8xf32>
    %77 = vector.shape_cast %76 : vector<8xf32> to vector<8x1xf32>
    %78 = vector.broadcast %77 : vector<8x1xf32> to vector<8x8xf32>
    %79 = arith.subf %75, %78 : vector<8x8xf32>
    %80 = math.exp %79 : vector<8x8xf32>
    %cst_25 = arith.constant dense<0.000000e+00> : vector<8xf32>
    %81 = vector.multi_reduction <add>, %80, %cst_25 [1] : vector<8x8xf32> to vector<8xf32>
    %82 = vector.shape_cast %81 : vector<8xf32> to vector<8x1xf32>
    %83 = tpu.reciprocal %82 {approx = true} : vector<8x1xf32> -> vector<8x1xf32>
    %84 = vector.broadcast %83 : vector<8x1xf32> to vector<8x8xf32>
    %85 = arith.mulf %80, %84 : vector<8x8xf32>
    %86 = arith.truncf %85 : vector<8x8xf32> to vector<8x8xbf16>
    %cst_26 = arith.constant dense<0.000000e+00> : vector<8x128xf32>
    %87 = tpu.matmul %86, %72, %cst_26 {dimension_numbers = #tpu.dot_dimension_numbers<[1], [0], [0], [1], [0, 0, 1, 1], [], []>} : vector<8x8xbf16>, vector<8x128xbf16>, vector<8x128xf32> -> vector<8x128xf32>
    %88 = tpu.concatenate %69, %87 in 0 : vector<8x128xf32>, vector<8x128xf32> -> vector<16x128xf32>
    %89 = arith.truncf %88 : vector<16x128xf32> to vector<16x128xbf16>
    %c0_27 = arith.constant 0 : index
    %c0_28 = arith.constant 0 : index
    %90 = vector.load %arg6[%c0_27, %c0_28] : memref<128x128xbf16, #tpu.memory_space<vmem>>, vector<128x128xbf16>
    %cst_29 = arith.constant dense<0.000000e+00> : vector<16x128xf32>
    %91 = tpu.matmul %89, %90, %cst_29 {dimension_numbers = #tpu.dot_dimension_numbers<[1], [0], [0], [1], [0, 0, 1, 1], [], []>} : vector<16x128xbf16>, vector<128x128xbf16>, vector<16x128xf32> -> vector<16x128xf32>
    %92 = arith.addf %1, %91 : vector<16x128xf32>
    %c0_30 = arith.constant 0 : index
    %c0_31 = arith.constant 0 : index
    %93 = vector.load %arg7[%c0_30, %c0_31] : memref<1x128xbf16, #tpu.memory_space<vmem>>, vector<1x128xbf16>
    %94 = arith.mulf %92, %92 : vector<16x128xf32>
    %cst_32 = arith.constant dense<0.000000e+00> : vector<16xf32>
    %95 = vector.multi_reduction <add>, %94, %cst_32 [1] : vector<16x128xf32> to vector<16xf32>
    %96 = vector.shape_cast %95 : vector<16xf32> to vector<16x1xf32>
    %cst_33 = arith.constant 1.280000e+02 : f32
    %97 = vector.broadcast %cst_33 : f32 to vector<16x1xf32>
    %98 = arith.divf %96, %97 : vector<16x1xf32>
    %cst_34 = arith.constant 9.99999997E-7 : f32
    %99 = vector.broadcast %cst_34 : f32 to vector<16x1xf32>
    %100 = arith.addf %98, %99 : vector<16x1xf32>
    %101 = math.rsqrt %100 : vector<16x1xf32>
    %102 = vector.broadcast %101 : vector<16x1xf32> to vector<16x128xf32>
    %103 = arith.mulf %92, %102 : vector<16x128xf32>
    %104 = arith.extf %93 : vector<1x128xbf16> to vector<1x128xf32>
    %105 = vector.broadcast %104 : vector<1x128xf32> to vector<16x128xf32>
    %106 = arith.mulf %103, %105 : vector<16x128xf32>
    %107 = arith.truncf %106 : vector<16x128xf32> to vector<16x128xbf16>
    %c0_35 = arith.constant 0 : index
    %c0_36 = arith.constant 0 : index
    %108 = vector.load %arg8[%c0_35, %c0_36] : memref<128x512xbf16, #tpu.memory_space<vmem>>, vector<128x512xbf16>
    %cst_37 = arith.constant dense<0.000000e+00> : vector<16x512xf32>
    %109 = tpu.matmul %107, %108, %cst_37 {dimension_numbers = #tpu.dot_dimension_numbers<[1], [0], [0], [1], [0, 0, 1, 1], [], []>} : vector<16x128xbf16>, vector<128x512xbf16>, vector<16x512xf32> -> vector<16x512xf32>
    %110 = vector.extract_strided_slice %109 {offsets = [0, 0], sizes = [16, 256], strides = [1, 1]} : vector<16x512xf32> to vector<16x256xf32>
    %111 = vector.extract_strided_slice %109 {offsets = [0, 256], sizes = [16, 256], strides = [1, 1]} : vector<16x512xf32> to vector<16x256xf32>
    %112 = arith.negf %110 : vector<16x256xf32>
    %113 = math.exp %112 : vector<16x256xf32>
    %cst_38 = arith.constant 1.000000e+00 : f32
    %114 = vector.broadcast %cst_38 : f32 to vector<16x256xf32>
    %115 = arith.addf %114, %113 : vector<16x256xf32>
    %116 = arith.divf %114, %115 : vector<16x256xf32>
    %117 = arith.mulf %110, %116 : vector<16x256xf32>
    %118 = arith.mulf %117, %111 : vector<16x256xf32>
    %119 = arith.truncf %118 : vector<16x256xf32> to vector<16x256xbf16>
    %c0_39 = arith.constant 0 : index
    %c0_40 = arith.constant 0 : index
    %120 = vector.load %arg9[%c0_39, %c0_40] : memref<256x128xbf16, #tpu.memory_space<vmem>>, vector<256x128xbf16>
    %cst_41 = arith.constant dense<0.000000e+00> : vector<16x128xf32>
    %121 = tpu.matmul %119, %120, %cst_41 {dimension_numbers = #tpu.dot_dimension_numbers<[1], [0], [0], [1], [0, 0, 1, 1], [], []>} : vector<16x256xbf16>, vector<256x128xbf16>, vector<16x128xf32> -> vector<16x128xf32>
    %122 = arith.addf %92, %121 : vector<16x128xf32>
    %123 = arith.truncf %122 : vector<16x128xf32> to vector<16x128xbf16>
    %c0_42 = arith.constant 0 : index
    %c0_43 = arith.constant 0 : index
    %124 = vector.load %arg10[%c0_42, %c0_43] : memref<16x128xbf16, #tpu.memory_space<vmem>>, vector<16x128xbf16>
    tpu.vector_store %arg10[%c0_42, %c0_43], %123 {strides = array<i32>} : memref<16x128xbf16, #tpu.memory_space<vmem>>, vector<16x128xbf16>,
    return
  }
}

module attributes {stable_mosaic.version = 11 : i64} {
  func.func @_decoder_layer_kernel(%arg0: memref<16x128xbf16, #tpu.memory_space<vmem>>, %arg1: memref<16x128xf32, #tpu.memory_space<vmem>>, %arg2: memref<16x128xf32, #tpu.memory_space<vmem>>, %arg3: memref<1x128xbf16, #tpu.memory_space<vmem>>, %arg4: memref<128x384xbf16, #tpu.memory_space<vmem>>, %arg5: memref<1x384xbf16, #tpu.memory_space<vmem>>, %arg6: memref<128x128xbf16, #tpu.memory_space<vmem>>, %arg7: memref<1x128xbf16, #tpu.memory_space<vmem>>, %arg8: memref<128x512xbf16, #tpu.memory_space<vmem>>, %arg9: memref<256x128xbf16, #tpu.memory_space<vmem>>, %arg10: memref<16x128xbf16, #tpu.memory_space<vmem>>) attributes {dimension_semantics = [], scalar_prefetch = 0 : i64, scratch_operands = 0 : i64, tpu.core_type = #tpu.core_type<tc>} {
    %c0 = arith.constant 0 : index
    %c0_0 = arith.constant 0 : index
    %0 = vector.load %arg0[%c0, %c0_0] : memref<16x128xbf16, #tpu.memory_space<vmem>>, vector<16x128xbf16>
    %1 = arith.extf %0 : vector<16x128xbf16> to vector<16x128xf32>
    %c0_1 = arith.constant 0 : index
    %c0_2 = arith.constant 0 : index
    %2 = vector.load %arg3[%c0_1, %c0_2] : memref<1x128xbf16, #tpu.memory_space<vmem>>, vector<1x128xbf16>
    %3 = arith.mulf %1, %1 : vector<16x128xf32>
    %cst = arith.constant dense<0.000000e+00> : vector<16xf32>
    %4 = vector.multi_reduction <add>, %3, %cst [1] : vector<16x128xf32> to vector<16xf32>
    %5 = vector.shape_cast %4 : vector<16xf32> to vector<16x1xf32>
    %cst_3 = arith.constant 1.280000e+02 : f32
    %6 = vector.broadcast %cst_3 : f32 to vector<16x1xf32>
    %7 = arith.divf %5, %6 : vector<16x1xf32>
    %cst_4 = arith.constant 9.99999997E-7 : f32
    %8 = vector.broadcast %cst_4 : f32 to vector<16x1xf32>
    %9 = arith.addf %7, %8 : vector<16x1xf32>
    %10 = math.rsqrt %9 : vector<16x1xf32>
    %11 = vector.broadcast %10 : vector<16x1xf32> to vector<16x128xf32>
    %12 = arith.mulf %1, %11 : vector<16x128xf32>
    %13 = arith.extf %2 : vector<1x128xbf16> to vector<1x128xf32>
    %14 = vector.broadcast %13 : vector<1x128xf32> to vector<16x128xf32>
    %15 = arith.mulf %12, %14 : vector<16x128xf32>
    %16 = arith.truncf %15 : vector<16x128xf32> to vector<16x128xbf16>
    %c0_5 = arith.constant 0 : index
    %c0_6 = arith.constant 0 : index
    %17 = vector.load %arg4[%c0_5, %c0_6] : memref<128x384xbf16, #tpu.memory_space<vmem>>, vector<128x384xbf16>
    %cst_7 = arith.constant dense<0.000000e+00> : vector<16x384xf32>
    %18 = tpu.matmul %16, %17, %cst_7 {dimension_numbers = #tpu.dot_dimension_numbers<[1], [0], [0], [1], [0, 0, 1, 1], [], []>} : vector<16x128xbf16>, vector<128x384xbf16>, vector<16x384xf32> -> vector<16x384xf32>
    %c0_8 = arith.constant 0 : index
    %c0_9 = arith.constant 0 : index
    %19 = vector.load %arg5[%c0_8, %c0_9] : memref<1x384xbf16, #tpu.memory_space<vmem>>, vector<1x384xbf16>
    %20 = arith.extf %19 : vector<1x384xbf16> to vector<1x384xf32>
    %21 = vector.broadcast %20 : vector<1x384xf32> to vector<16x384xf32>
    %22 = arith.addf %18, %21 : vector<16x384xf32>
    %c0_10 = arith.constant 0 : index
    %c0_11 = arith.constant 0 : index
    %23 = vector.load %arg1[%c0_10, %c0_11] : memref<16x128xf32, #tpu.memory_space<vmem>>, vector<16x128xf32>
    %c0_12 = arith.constant 0 : index
    %c0_13 = arith.constant 0 : index
    %24 = vector.load %arg2[%c0_12, %c0_13] : memref<16x128xf32, #tpu.memory_space<vmem>>, vector<16x128xf32>
    %25 = vector.extract_strided_slice %22 {offsets = [0, 0], sizes = [16, 128], strides = [1, 1]} : vector<16x384xf32> to vector<16x128xf32>
    %26 = vector.extract_strided_slice %22 {offsets = [0, 128], sizes = [16, 128], strides = [1, 1]} : vector<16x384xf32> to vector<16x128xf32>
    %27 = vector.extract_strided_slice %22 {offsets = [0, 256], sizes = [16, 128], strides = [1, 1]} : vector<16x384xf32> to vector<16x128xf32>
    %28 = arith.mulf %25, %23 : vector<16x128xf32>
    %29 = vector.extract_strided_slice %25 {offsets = [0, 64], sizes = [16, 64], strides = [1, 1]} : vector<16x128xf32> to vector<16x64xf32>
    %cst_14 = arith.constant 0.000000e+00 : f32
    %30 = vector.broadcast %cst_14 : f32 to vector<16x64xf32>
    %31 = arith.subf %30, %29 : vector<16x64xf32>
    %32 = vector.extract_strided_slice %25 {offsets = [0, 0], sizes = [16, 64], strides = [1, 1]} : vector<16x128xf32> to vector<16x64xf32>
    %33 = tpu.concatenate %31, %32 in 1 : vector<16x64xf32>, vector<16x64xf32> -> vector<16x128xf32>
    %34 = arith.mulf %33, %24 : vector<16x128xf32>
    %35 = arith.addf %28, %34 : vector<16x128xf32>
    %cst_15 = arith.constant 0.0883883461 : f32
    %36 = vector.broadcast %cst_15 : f32 to vector<16x128xf32>
    %37 = arith.mulf %35, %36 : vector<16x128xf32>
    %38 = arith.truncf %37 : vector<16x128xf32> to vector<16x128xbf16>
    %39 = arith.mulf %26, %23 : vector<16x128xf32>
    %40 = vector.extract_strided_slice %26 {offsets = [0, 64], sizes = [16, 64], strides = [1, 1]} : vector<16x128xf32> to vector<16x64xf32>
    %cst_16 = arith.constant 0.000000e+00 : f32
    %41 = vector.broadcast %cst_16 : f32 to vector<16x64xf32>
    %42 = arith.subf %41, %40 : vector<16x64xf32>
    %43 = vector.extract_strided_slice %26 {offsets = [0, 0], sizes = [16, 64], strides = [1, 1]} : vector<16x128xf32> to vector<16x64xf32>
    %44 = tpu.concatenate %42, %43 in 1 : vector<16x64xf32>, vector<16x64xf32> -> vector<16x128xf32>
    %45 = arith.mulf %44, %24 : vector<16x128xf32>
    %46 = arith.addf %39, %45 : vector<16x128xf32>
    %47 = arith.truncf %46 : vector<16x128xf32> to vector<16x128xbf16>
    %48 = arith.truncf %27 : vector<16x128xf32> to vector<16x128xbf16>
    %49 = tpu.iota {dimensions = array<i32: 0>} : vector<8x8xi32>
    %50 = tpu.iota {dimensions = array<i32: 1>} : vector<8x8xi32>
    %51 = arith.cmpi sle, %50, %49 : vector<8x8xi32>
    %52 = vector.extract_strided_slice %38 {offsets = [0, 0], sizes = [8, 128], strides = [1, 1]} : vector<16x128xbf16> to vector<8x128xbf16>
    %53 = vector.extract_strided_slice %47 {offsets = [0, 0], sizes = [8, 128], strides = [1, 1]} : vector<16x128xbf16> to vector<8x128xbf16>
    %54 = vector.extract_strided_slice %48 {offsets = [0, 0], sizes = [8, 128], strides = [1, 1]} : vector<16x128xbf16> to vector<8x128xbf16>
    %cst_17 = arith.constant dense<0.000000e+00> : vector<8x8xf32>
    %55 = tpu.matmul %52, %53, %cst_17 {dimension_numbers = #tpu.dot_dimension_numbers<[1], [1], [0], [0], [0, 0, 1, 0], [], []>} : vector<8x128xbf16>, vector<8x128xbf16>, vector<8x8xf32> -> vector<8x8xf32>
    %cst_18 = arith.constant 0xFF800000 : f32
    %56 = vector.broadcast %cst_18 : f32 to vector<8x8xf32>
    %57 = arith.select %51, %55, %56 : vector<8x8xi1>, vector<8x8xf32>
    %cst_19 = arith.constant dense<0xFF800000> : vector<8xf32>
    %58 = vector.multi_reduction <maximumf>, %57, %cst_19 [1] : vector<8x8xf32> to vector<8xf32>
    %59 = vector.shape_cast %58 : vector<8xf32> to vector<8x1xf32>
    %60 = vector.broadcast %59 : vector<8x1xf32> to vector<8x8xf32>
    %61 = arith.subf %57, %60 : vector<8x8xf32>
    %62 = math.exp %61 : vector<8x8xf32>
    %cst_20 = arith.constant dense<0.000000e+00> : vector<8xf32>
    %63 = vector.multi_reduction <add>, %62, %cst_20 [1] : vector<8x8xf32> to vector<8xf32>
    %64 = vector.shape_cast %63 : vector<8xf32> to vector<8x1xf32>
    %65 = tpu.reciprocal %64 {approx = true} : vector<8x1xf32> -> vector<8x1xf32>
    %66 = vector.broadcast %65 : vector<8x1xf32> to vector<8x8xf32>
    %67 = arith.mulf %62, %66 : vector<8x8xf32>
    %68 = arith.truncf %67 : vector<8x8xf32> to vector<8x8xbf16>
    %cst_21 = arith.constant dense<0.000000e+00> : vector<8x128xf32>
    %69 = tpu.matmul %68, %54, %cst_21 {dimension_numbers = #tpu.dot_dimension_numbers<[1], [0], [0], [1], [0, 0, 1, 1], [], []>} : vector<8x8xbf16>, vector<8x128xbf16>, vector<8x128xf32> -> vector<8x128xf32>
    %70 = vector.extract_strided_slice %38 {offsets = [8, 0], sizes = [8, 128], strides = [1, 1]} : vector<16x128xbf16> to vector<8x128xbf16>
    %71 = vector.extract_strided_slice %47 {offsets = [8, 0], sizes = [8, 128], strides = [1, 1]} : vector<16x128xbf16> to vector<8x128xbf16>
    %72 = vector.extract_strided_slice %48 {offsets = [8, 0], sizes = [8, 128], strides = [1, 1]} : vector<16x128xbf16> to vector<8x128xbf16>
    %cst_22 = arith.constant dense<0.000000e+00> : vector<8x8xf32>
    %73 = tpu.matmul %70, %71, %cst_22 {dimension_numbers = #tpu.dot_dimension_numbers<[1], [1], [0], [0], [0, 0, 1, 0], [], []>} : vector<8x128xbf16>, vector<8x128xbf16>, vector<8x8xf32> -> vector<8x8xf32>
    %cst_23 = arith.constant 0xFF800000 : f32
    %74 = vector.broadcast %cst_23 : f32 to vector<8x8xf32>
    %75 = arith.select %51, %73, %74 : vector<8x8xi1>, vector<8x8xf32>
    %cst_24 = arith.constant dense<0xFF800000> : vector<8xf32>
    %76 = vector.multi_reduction <maximumf>, %75, %cst_24 [1] : vector<8x8xf32> to vector<8xf32>
    %77 = vector.shape_cast %76 : vector<8xf32> to vector<8x1xf32>
    %78 = vector.broadcast %77 : vector<8x1xf32> to vector<8x8xf32>
    %79 = arith.subf %75, %78 : vector<8x8xf32>
    %80 = math.exp %79 : vector<8x8xf32>
    %cst_25 = arith.constant dense<0.000000e+00> : vector<8xf32>
    %81 = vector.multi_reduction <add>, %80, %cst_25 [1] : vector<8x8xf32> to vector<8xf32>
    %82 = vector.shape_cast %81 : vector<8xf32> to vector<8x1xf32>
    %83 = tpu.reciprocal %82 {approx = true} : vector<8x1xf32> -> vector<8x1xf32>
    %84 = vector.broadcast %83 : vector<8x1xf32> to vector<8x8xf32>
    %85 = arith.mulf %80, %84 : vector<8x8xf32>
    %86 = arith.truncf %85 : vector<8x8xf32> to vector<8x8xbf16>
    %cst_26 = arith.constant dense<0.000000e+00> : vector<8x128xf32>
    %87 = tpu.matmul %86, %72, %cst_26 {dimension_numbers = #tpu.dot_dimension_numbers<[1], [0], [0], [1], [0, 0, 1, 1], [], []>} : vector<8x8xbf16>, vector<8x128xbf16>, vector<8x128xf32> -> vector<8x128xf32>
    %88 = tpu.concatenate %69, %87 in 0 : vector<8x128xf32>, vector<8x128xf32> -> vector<16x128xf32>
    %89 = arith.truncf %88 : vector<16x128xf32> to vector<16x128xbf16>
    %c0_27 = arith.constant 0 : index
    %c0_28 = arith.constant 0 : index
    %90 = vector.load %arg6[%c0_27, %c0_28] : memref<128x128xbf16, #tpu.memory_space<vmem>>, vector<128x128xbf16>
    %cst_29 = arith.constant dense<0.000000e+00> : vector<16x128xf32>
    %91 = tpu.matmul %89, %90, %cst_29 {dimension_numbers = #tpu.dot_dimension_numbers<[1], [0], [0], [1], [0, 0, 1, 1], [], []>} : vector<16x128xbf16>, vector<128x128xbf16>, vector<16x128xf32> -> vector<16x128xf32>
    %92 = arith.addf %1, %91 : vector<16x128xf32>
    %c0_30 = arith.constant 0 : index
    %c0_31 = arith.constant 0 : index
    %93 = vector.load %arg7[%c0_30, %c0_31] : memref<1x128xbf16, #tpu.memory_space<vmem>>, vector<1x128xbf16>
    %94 = arith.mulf %92, %92 : vector<16x128xf32>
    %cst_32 = arith.constant dense<0.000000e+00> : vector<16xf32>
    %95 = vector.multi_reduction <add>, %94, %cst_32 [1] : vector<16x128xf32> to vector<16xf32>
    %96 = vector.shape_cast %95 : vector<16xf32> to vector<16x1xf32>
    %cst_33 = arith.constant 1.280000e+02 : f32
    %97 = vector.broadcast %cst_33 : f32 to vector<16x1xf32>
    %98 = arith.divf %96, %97 : vector<16x1xf32>
    %cst_34 = arith.constant 9.99999997E-7 : f32
    %99 = vector.broadcast %cst_34 : f32 to vector<16x1xf32>
    %100 = arith.addf %98, %99 : vector<16x1xf32>
    %101 = math.rsqrt %100 : vector<16x1xf32>
    %102 = vector.broadcast %101 : vector<16x1xf32> to vector<16x128xf32>
    %103 = arith.mulf %92, %102 : vector<16x128xf32>
    %104 = arith.extf %93 : vector<1x128xbf16> to vector<1x128xf32>
    %105 = vector.broadcast %104 : vector<1x128xf32> to vector<16x128xf32>
    %106 = arith.mulf %103, %105 : vector<16x128xf32>
    %107 = arith.truncf %106 : vector<16x128xf32> to vector<16x128xbf16>
    %c0_35 = arith.constant 0 : index
    %c0_36 = arith.constant 0 : index
    %108 = vector.load %arg8[%c0_35, %c0_36] : memref<128x512xbf16, #tpu.memory_space<vmem>>, vector<128x512xbf16>
    %cst_37 = arith.constant dense<0.000000e+00> : vector<16x512xf32>
    %109 = tpu.matmul %107, %108, %cst_37 {dimension_numbers = #tpu.dot_dimension_numbers<[1], [0], [0], [1], [0, 0, 1, 1], [], []>} : vector<16x128xbf16>, vector<128x512xbf16>, vector<16x512xf32> -> vector<16x512xf32>
    %110 = vector.extract_strided_slice %109 {offsets = [0, 0], sizes = [16, 256], strides = [1, 1]} : vector<16x512xf32> to vector<16x256xf32>
    %111 = vector.extract_strided_slice %109 {offsets = [0, 256], sizes = [16, 256], strides = [1, 1]} : vector<16x512xf32> to vector<16x256xf32>
    %112 = arith.negf %110 : vector<16x256xf32>
    %113 = math.exp %112 : vector<16x256xf32>
    %cst_38 = arith.constant 1.000000e+00 : f32
    %114 = vector.broadcast %cst_38 : f32 to vector<16x256xf32>
    %115 = arith.addf %114, %113 : vector<16x256xf32>
    %116 = arith.divf %114, %115 : vector<16x256xf32>
    %117 = arith.mulf %110, %116 : vector<16x256xf32>
    %118 = arith.mulf %117, %111 : vector<16x256xf32>
    %119 = arith.truncf %118 : vector<16x256xf32> to vector<16x256xbf16>
    %c0_39 = arith.constant 0 : index
    %c0_40 = arith.constant 0 : index
    %120 = vector.load %arg9[%c0_39, %c0_40] : memref<256x128xbf16, #tpu.memory_space<vmem>>, vector<256x128xbf16>
    %cst_41 = arith.constant dense<0.000000e+00> : vector<16x128xf32>
    %121 = tpu.matmul %119, %120, %cst_41 {dimension_numbers = #tpu.dot_dimension_numbers<[1], [0], [0], [1], [0, 0, 1, 1], [], []>} : vector<16x256xbf16>, vector<256x128xbf16>, vector<16x128xf32> -> vector<16x128xf32>
    %122 = arith.addf %92, %121 : vector<16x128xf32>
    %123 = arith.truncf %122 : vector<16x128xf32> to vector<16x128xbf16>
    %c0_42 = arith.constant 0 : index
    %c0_43 = arith.constant 0 : index
    %124 = vector.load %arg10[%c0_42, %c0_43] : memref<16x128xbf16, #tpu.memory_space<vmem>>, vector<16x128xbf16>
    tpu.vector_store %arg10[%c0_42, %c0_43], %123 {strides = array<i32>} : memref<16x128xbf16, #tpu.memory_space<vmem>>, vector<16x128xbf16>,
    return
  }
}

</mosaic_0001>

<bundles_post_ra>
// kernel: forward.5
= control target key start
LH: loop header
LB: loop body
LE: loop exit
PB: predicated region body
PF: predicated region fallthrough
CT: control target
= control target key end

     0   :  { %s383_s0 = inlined_call_operand.vmem [shape: bf16[16,128], index: 0, kind: input, shape index: {}]   ;;  %s384_s1 = inlined_call_operand.vmem [shape: bf16[1,128], index: 1, kind: input, shape index: {}]   ;;  %s385_s2 = inlined_call_operand.vmem [shape: bf16[128,256], index: 2, kind: input, shape index: {}]   ;;  %s386_s3 = inlined_call_operand.hbm [shape: bf16[16,256], index: 3, kind: output, shape index: {}]  }
   0x1   :  { %v234_v0 = vld [vmem:[%s383_s0] sm:$0xff]   ;;  %v244_v5 = vld [vmem:[%s385_s2 + $0x14] ss:$8 sps:$4 sm:$0xff]   ;;  %v246_v6 = vld [vmem:[%s385_s2 + $0x10] ss:$8 sps:$4 sm:$0xff]  }
   0x2   :  { %v235_v1 = vunpack.c.l.bf16 %v234_v0  ;;  %v236_v2 = vunpack.c.h.bf16 %v234_v0  ;;  %v241_v3 = vld [vmem:[%s385_s2 + $0x4] ss:$8 sps:$4 sm:$0xff]   ;;  %v243_v4 = vld [vmem:[%s385_s2] ss:$8 sps:$4 sm:$0xff]  }
   0x3   :  { %140 = vmatprep.subr.bf16.mxu0 %v241_v3 }
   0x4   :  { %v21_v7 = vmul.f32 %v235_v1, %v235_v1  ;;  %141 = vmatpush1.bf16.msra.mxu0 %v243_v4  ;;  %v22_v8 = vmul.f32 %v236_v2, %v236_v2 }
   0x5   :  { %142 = vmatprep.subr.bf16.mxu0 %v244_v5 }
   0x6   :  { %23 = vadd.xlane.f32.xlu0 %v21_v7 }
   0x7   :  { %8 = vsyncpa [#allocation3], 0  ;;  %v247_v9 = vld [vmem:[%s385_s2 + $0x24] ss:$8 sps:$4 sm:$0xff]   ;;  %v249_v10 = vld [vmem:[%s385_s2 + $0x20] ss:$8 sps:$4 sm:$0xff]   ;;  %v37_v27 = vlaneseq }
   0x8   :  { %143 = vmatpush1.bf16.msra.mxu0 %v246_v6  ;;  %v250_v11 = vld [vmem:[%s385_s2 + $0x34] ss:$8 sps:$4 sm:$0xff]   ;;  %v252_v12 = vld [vmem:[%s385_s2 + $0x30] ss:$8 sps:$4 sm:$0xff]   ;;  %v253_v13 = vld [vmem:[%s385_s2 + $0x44] ss:$8 sps:$4 sm:$0xff]  }
   0x9   :  { %144 = vmatprep.subr.bf16.mxu0 %v247_v9  ;;  %v255_v14 = vld [vmem:[%s385_s2 + $0x40] ss:$8 sps:$4 sm:$0xff]   ;;  %v256_v15 = vld [vmem:[%s385_s2 + $0x54] ss:$8 sps:$4 sm:$0xff]   ;;  %v258_v16 = vld [vmem:[%s385_s2 + $0x50] ss:$8 sps:$4 sm:$0xff]  }
   0xa   :  { %25 = vadd.xlane.f32.xlu0 %v22_v8  ;;  %v259_v17 = vld [vmem:[%s385_s2 + $0x64] ss:$8 sps:$4 sm:$0xff]   ;;  %v293_v18 = vmov 0   ;;  %v261_v19 = vld [vmem:[%s385_s2 + $0x60] ss:$8 sps:$4 sm:$0xff]   ;;  %v38_v29 = vshrl.u32 %v37_v27, 7 }
   0xb   :  { %172 = vmatprep.mubr.bf16.mxu0 %v293_v18  ;;  %v262_v20 = vld [vmem:[%s385_s2 + $0x74] ss:$8 sps:$4 sm:$0xff]   ;;  %v264_v21 = vld [vmem:[%s385_s2 + $0x70] ss:$8 sps:$4 sm:$0xff]   ;;  %v20_v30 = vld [vmem:[%s384_s1] sm:$0x1] }
   0xc   :  { %145 = vmatpush1.bf16.msra.mxu0 %v249_v10  ;;  %v36_v31 = vunpack.c.l.bf16 %v20_v30  ;;  %v39_v32 = vsub.s32 0, %v38_v29  ;;  %s294_s2 = smov [#allocation2]  }
   0xd   :  { %146 = vmatprep.subr.bf16.mxu0 %v250_v11  ;;  %s202_s20 = sshll.u32 %s294_s2, 4  ;;  %s203_s20 = int_to_ptr.vmem [resolvable:$true] %s202_s20 }
   0xe   :  { %v40_v35 = vrot.slane %v36_v31, %v39_v32  ;;  %s269_s1 = scalar_lea.vmem %s203_s20, 256  ;;  %p274_p1 = scmp.lt.s32.totalorder %s203_s20, %s203_s20 }
   0xf   :  { %p270_p0 = scmp.ne.s32.totalorder %s203_s20, %s269_s1  ;;  %p275_p2 = scmp.lt.s32.totalorder %s269_s1, %s269_s1 }
  0x10   :  { %147 = vmatpush1.bf16.msra.mxu0 %v252_v12 }
  0x11   :  { %148 = vmatprep.subr.bf16.mxu0 %v253_v13  ;;  %p276_p3 = por %p275_p2, %p274_p1 }
  0x13   :  { %p277_p4 = pnand %p276_p3, %p270_p0 }
  0x14   :  { %149 = vmatpush1.bf16.msra.mxu0 %v255_v14 }
  0x15   :  { %150 = vmatprep.subr.bf16.mxu0 %v256_v15 }
  0x18   :  { %151 = vmatpush1.bf16.msra.mxu0 %v258_v16 }
  0x19   :  { %152 = vmatprep.subr.bf16.mxu0 %v259_v17 }
  0x1c   :  { %153 = vmatpush1.bf16.msra.mxu0 %v261_v19 }
  0x1d   :  { %154 = vmatprep.subr.bf16.mxu0 %v262_v20 }
  0x20   :  { %155 = vmatpush1.bf16.msra.mxu0 %v264_v21 }
  0x93   :  { %v24_v22 = vpop.xlane.xlu0 %23 }
  0x94   :  { %v28_v23 = vmul.f32 0.0078125, %v24_v22 }
  0x96   :  { %v30_v24 = vadd.f32 1e-06, %v28_v23 }
  0x97   :  { %v26_v25 = vpop.xlane.xlu0 %25 }
  0x98   :  { %265 = vrsqrt.f32 %v30_v24  ;;  %v29_v26 = vmul.f32 0.0078125, %v26_v25 }
  0x9a   :  { %v31_v28 = vadd.f32 1e-06, %v29_v26 }
  0x9c   :  { %267 = vrsqrt.f32 %v31_v28 }
  0xa2   :  { %v266_v33 = vpop.eup %265 }
  0xa3   :  { %v34_v34 = vmul.f32 %v266_v33, %v235_v1 }
  0xa5   :  { %v41_v38 = vmul.f32 %v40_v35, %v34_v34 }
  0xa6   :  { %v268_v36 = vpop.eup %267 }
  0xa7   :  { %v35_v37 = vmul.f32 %v268_v36, %v236_v2 }
  0xa9   :  { %v42_v39 = vmul.f32 %v40_v35, %v35_v37 }
  0xab   :  { %v43_v40 = vpack.c.bf16 %v42_v39, %v41_v38 }
  0xad   :  { %173 = vmatmul.mubr.bf16.vlgmr.msra.gmra.mrb[0].mxu0 %v43_v40 }
 0x180   :  { %v174_v41 = vpop.f32.mrb[0].mxu0 }
 0x181   :  { %v176_v42 = vpop.f32.mrb[1].mxu0 }
 0x182   :  { %v231_v43 = vpack.c.bf16 %v176_v42, %v174_v41  ;;  %v178_v44 = vpop.f32.mrb[2].mxu0 }
 0x183   :  { %v180_v45 = vpop.f32.mrb[3].mxu0 }
 0x184   :  { %195 = vst [vmem:[#allocation2] sm:$0xff] %v231_v43  ;;  %v232_v46 = vpack.c.bf16 %v180_v45, %v178_v44 }
 0x186   :  { %196 = vst [vmem:[#allocation2 + $0x8] sm:$0xff] %v232_v46 }
 0x187   :  { %280 = shalt.err (!%p277_p4)
}
 0x188   :  { %s281_s22 = scalar_lea.hbm %s386_s3, 256 }
 0x189   :  { %p282_p5 = scmp.ne.s32.totalorder %s386_s3, %s281_s22  ;;  %p285_p6 = scmp.lt.u32.totalorder %s281_s22, %s386_s3 }
 0x18b   :  { %p287_p7 = pnand %p285_p6, %p282_p5 }
 0x18d   :  { %290 = shalt.err (!%p287_p7)
}
 0x18e   :  { %s295_s27 = smov 128   ;;  %s296_s28 = smov 8  }
 0x18f   :  { %208 = dma.vmem_to_hbm [thread:$0]  %s203_s20, 256, %s386_s3, [#allocation3], %s295_s27, %s295_s27, %s296_s28  }
 0x190   :  { %291 = dma.done.wait [#allocation3], 256  }
 0x191   :  { %292 = vsyncadd [#allocation3], 4294967040 }
 0x192   :  { %212 = vsyncpa [#allocation3], 1 }

// kernel: forward.4
= control target key start
LH: loop header
LB: loop body
LE: loop exit
PB: predicated region body
PF: predicated region fallthrough
CT: control target
= control target key end

     0   :  { %v1592_v1 = vmov 0.0   ;;  %v1593_v25 = vmov 0   ;;  %vm1594_vm0 = vmmov 0   ;;  %v57_v36 = vlaneseq  ;;  %s2006_s0 = inlined_call_operand.vmem [shape: bf16[16,128], index: 0, kind: input, shape index: {}]   ;;  %s2007_s4 = inlined_call_operand.vmem [shape: bf16[128,384], index: 4, kind: input, shape index: {}]   ;;  %s2008_s3 = inlined_call_operand.vmem [shape: bf16[1,128], index: 3, kind: input, shape index: {}]   ;;  %s2009_s5 = inlined_call_operand.vmem [shape: bf16[1,384], index: 5, kind: input, shape index: {}]   ;;  %s2010_s2 = inlined_call_operand.vmem [shape: f32[16,128], index: 2, kind: input, shape index: {}]   ;;  %s2011_s1 = inlined_call_operand.vmem [shape: f32[16,128], index: 1, kind: input, shape index: {}]   ;;  %s2012_s6 = inlined_call_operand.vmem [shape: bf16[128,128], index: 6, kind: input, shape index: {}]   ;;  %s2013_s8 = inlined_call_operand.vmem [shape: bf16[128,512], index: 8, kind: input, shape index: {}]   ;;  %s2014_s7 = inlined_call_operand.vmem [shape: bf16[1,128], index: 7, kind: input, shape index: {}]   ;;  %s2015_s9 = inlined_call_operand.vmem [shape: bf16[256,128], index: 9, kind: input, shape index: {}]   ;;  %s2016_s10 = inlined_call_operand.vmem [shape: bf16[16,128], index: 10, kind: output, shape index: {}]  }
   0x1   :  { %v1332_v0 = vld [vmem:[%s2006_s0] sm:$0xff]   ;;  %1388 = vmatprep.subr.bf16.mxu1 %v1592_v1  ;;  %v1459_v6 = vld [vmem:[%s2007_s4 + $0x8] ss:$12 sps:$4 sm:$0xff]   ;;  %v1466_v13 = vld [vmem:[%s2007_s4 + $0x30] ss:$12 sps:$4 sm:$0xff]   ;;  %286 = vmatprep.mubr.bf16.mxu0 %v1593_v25  ;;  %vm462_vm1 = vcmask 1043456  }
   0x2   :  { %v1655_v2 = vunpack.c.l.bf16 %v1332_v0  ;;  %v1657_v3 = vunpack.c.h.bf16 %v1332_v0  ;;  %v1456_v4 = vld [vmem:[%s2007_s4 + $0x4] ss:$12 sps:$4 sm:$0xff]   ;;  %v1458_v5 = vld [vmem:[%s2007_s4] ss:$12 sps:$4 sm:$0xff]   ;;  %v1460_v8 = vld [vmem:[%s2007_s4 + $0x1c] ss:$12 sps:$4 sm:$0xff]   ;;  %1389 = vmatpush3.bf16.msra.mxu1 %v1459_v6  ;;  %1404 = vmatprep.mubr.msk.bf16.mxu1 %vm1594_vm0, %v1592_v1 }
   0x3   :  { %254 = vmatprep.subr.bf16.mxu0 %v1456_v4  ;;  %v1462_v9 = vld [vmem:[%s2007_s4 + $0x18] ss:$12 sps:$4 sm:$0xff]   ;;  %v1463_v10 = vld [vmem:[%s2007_s4 + $0x20] ss:$12 sps:$4 sm:$0xff]   ;;  %1390 = vmatprep.subr.bf16.mxu1 %v1592_v1  ;;  %v1470_v16 = vld [vmem:[%s2007_s4 + $0x48] ss:$12 sps:$4 sm:$0xff]  }
   0x4   :  { %v41_v7 = vmul.f32 %v1655_v2, %v1655_v2  ;;  %255 = vmatpush1.bf16.msra.mxu0 %v1458_v5  ;;  %v42_v11 = vmul.f32 %v1657_v3, %v1657_v3  ;;  %v1464_v12 = vld [vmem:[%s2007_s4 + $0x34] ss:$12 sps:$4 sm:$0xff]   ;;  %v1467_v14 = vld [vmem:[%s2007_s4 + $0x38] ss:$12 sps:$4 sm:$0xff]   ;;  %v1471_v17 = vld [vmem:[%s2007_s4 + $0x50] ss:$12 sps:$4 sm:$0xff]  }
   0x5   :  { %256 = vmatprep.subr.bf16.mxu0 %v1460_v8  ;;  %v1468_v15 = vld [vmem:[%s2007_s4 + $0x4c] ss:$12 sps:$4 sm:$0xff]   ;;  %v1472_v18 = vld [vmem:[%s2007_s4 + $0x64] ss:$12 sps:$4 sm:$0xff]   ;;  %v1475_v20 = vld [vmem:[%s2007_s4 + $0x68] ss:$12 sps:$4 sm:$0xff]  }
   0x6   :  { %43 = vadd.xlane.f32.xlu0 %v41_v7  ;;  %1391 = vmatpush3.bf16.msra.mxu1 %v1463_v10  ;;  %v1474_v19 = vld [vmem:[%s2007_s4 + $0x60] ss:$12 sps:$4 sm:$0xff]   ;;  %v1476_v21 = vld [vmem:[%s2007_s4 + $0x7c] ss:$12 sps:$4 sm:$0xff]   ;;  %v1478_v22 = vld [vmem:[%s2007_s4 + $0x78] ss:$12 sps:$4 sm:$0xff]  }
   0x7   :  { %1392 = vmatprep.subr.bf16.mxu1 %v1592_v1  ;;  %v1479_v23 = vld [vmem:[%s2007_s4 + $0x80] ss:$12 sps:$4 sm:$0xff]   ;;  %v1482_v26 = vld [vmem:[%s2007_s4 + $0x90] ss:$12 sps:$4 sm:$0xff]   ;;  %v1483_v27 = vld [vmem:[%s2007_s4 + $0x98] ss:$12 sps:$4 sm:$0xff]  }
   0x8   :  { %257 = vmatpush1.bf16.msra.mxu0 %v1462_v9  ;;  %v1480_v24 = vld [vmem:[%s2007_s4 + $0x94] ss:$12 sps:$4 sm:$0xff]   ;;  %v1484_v28 = vld [vmem:[%s2007_s4 + $0xac] ss:$12 sps:$4 sm:$0xff]   ;;  %v1487_v30 = vld [vmem:[%s2007_s4 + $0xb0] ss:$12 sps:$4 sm:$0xff]  }
   0x9   :  { %258 = vmatprep.subr.bf16.mxu0 %v1464_v12  ;;  %v1486_v29 = vld [vmem:[%s2007_s4 + $0xa8] ss:$12 sps:$4 sm:$0xff]   ;;  %v1748_v38 = vshrl.u32 %v57_v36, 7  ;;  %v40_v39 = vld [vmem:[%s2008_s3] sm:$0x1]  ;;  %vm362_vm2 = vcmask 523264  }
   0xa   :  { %45 = vadd.xlane.f32.xlu0 %v42_v11  ;;  %1393 = vmatpush3.bf16.msra.mxu1 %v1467_v14  ;;  %v56_v40 = vunpack.c.l.bf16 %v40_v39  ;;  %v96_v50 = vld [vmem:[%s2009_s5] sm:$0x7]  ;;  %s1595_s5 = smov 64   ;;  %vm446_vm4 = vcmask 64512  }
   0xb   :  { %1394 = vmatprep.subr.bf16.mxu1 %v1592_v1  ;;  %v1754_v41 = vsub.s32 0, %v1748_v38  ;;  %v97_v51 = vunpack.c.l.bf16 %v96_v50  ;;  %v105_v52 = vsub.s32 2, %v1748_v38  ;;  %v109_v53 = vsub.s32 4, %v1748_v38 }
   0xc   :  { %259 = vmatpush1.bf16.msra.mxu0 %v1466_v13 }
   0xd   :  { %260 = vmatprep.subr.bf16.mxu0 %v1468_v15  ;;  %v60_v44 = vrot.slane %v56_v40, %v1754_v41  ;;  %v102_v54 = vrot.slane %v97_v51, %v1754_v41  ;;  %v106_v55 = vrot.slane %v97_v51, %v105_v52  ;;  %v110_v56 = vrot.slane %v97_v51, %v109_v53 }
   0xe   :  { %1395 = vmatpush3.bf16.msra.mxu1 %v1471_v17 }
   0xf   :  { %1396 = vmatprep.subr.bf16.mxu1 %v1592_v1  ;;  %v117_v57 = vrot.slane %v102_v54, %v1754_v41  ;;  %v121_v58 = vrot.slane %v106_v55, %v1754_v41  ;;  %v125_v59 = vrot.slane %v110_v56, %v1754_v41 }
  0x10   :  { %261 = vmatpush1.bf16.msra.mxu0 %v1470_v16 }
  0x11   :  { %262 = vmatprep.subr.bf16.mxu0 %v1472_v18 }
  0x12   :  { %1397 = vmatpush3.bf16.msra.mxu1 %v1475_v20 }
  0x13   :  { %1398 = vmatprep.subr.bf16.mxu1 %v1592_v1 }
  0x14   :  { %263 = vmatpush1.bf16.msra.mxu0 %v1474_v19 }
  0x15   :  { %264 = vmatprep.subr.bf16.mxu0 %v1476_v21 }
  0x16   :  { %1399 = vmatpush3.bf16.msra.mxu1 %v1479_v23 }
  0x17   :  { %1400 = vmatprep.subr.bf16.mxu1 %v1592_v1 }
  0x18   :  { %265 = vmatpush1.bf16.msra.mxu0 %v1478_v22 }
  0x19   :  { %266 = vmatprep.subr.bf16.mxu0 %v1480_v24 }
  0x1a   :  { %1401 = vmatpush3.bf16.msra.mxu1 %v1483_v27  ;;  %v340_v27 = vld [vmem:[%s2010_s2] sm:$0xff] }
  0x1b   :  { %1402 = vmatprep.subr.bf16.mxu1 %v1592_v1 }
  0x1c   :  { %267 = vmatpush1.bf16.msra.mxu0 %v1482_v26 }
  0x1d   :  { %268 = vmatprep.subr.bf16.mxu0 %v1484_v28 }
  0x1e   :  { %1403 = vmatpush3.bf16.msra.mxu1 %v1487_v30  ;;  %v339_v30 = vld [vmem:[%s2011_s1 + $0x8] sm:$0xff] }
  0x1f   :  { %1414 = vmatprep.subr.bf16.mxu1 %v1592_v1 }
  0x20   :  { %269 = vmatpush1.bf16.msra.mxu0 %v1486_v29  ;;  %v338_v29 = vld [vmem:[%s2011_s1] sm:$0xff] }
  0x21   :  { %1408 = vmatprep.subr.bf16.mxu0 %v1592_v1 }
  0x93   :  { %v44_v31 = vpop.xlane.xlu0 %43 }
  0x94   :  { %v48_v32 = vmul.f32 0.0078125, %v44_v31  ;;  %v341_v31 = vld [vmem:[%s2010_s2 + $0x8] sm:$0xff] }
  0x96   :  { %v50_v33 = vadd.f32 1e-06, %v48_v32 }
  0x97   :  { %v46_v34 = vpop.xlane.xlu0 %45 }
  0x98   :  { %1560 = vrsqrt.f32 %v50_v33  ;;  %v49_v35 = vmul.f32 0.0078125, %v46_v34 }
  0x9a   :  { %v51_v37 = vadd.f32 1e-06, %v49_v35 }
  0x9c   :  { %1562 = vrsqrt.f32 %v51_v37 }
  0xa2   :  { %v1561_v42 = vpop.eup %1560 }
  0xa3   :  { %v54_v43 = vmul.f32 %v1561_v42, %v1655_v2 }
  0xa5   :  { %v61_v47 = vmul.f32 %v60_v44, %v54_v43 }
  0xa6   :  { %v1563_v45 = vpop.eup %1562 }
  0xa7   :  { %v55_v46 = vmul.f32 %v1563_v45, %v1657_v3 }
  0xa9   :  { %v62_v48 = vmul.f32 %v60_v44, %v55_v46 }
  0xab   :  { %v63_v49 = vpack.c.bf16 %v62_v48, %v61_v47 }
  0xad   :  { %287 = vmatmul.mubr.bf16.vlgmr.msra.gmra.mrb[0].mxu0 %v63_v49  ;;  %1405 = vmatmul.mubr.bf16.vlgmr.msra.gmra.mrb[0].mxu1 %v63_v49 }
  0xae   :  { %1410 = vmatprep.mubr.msk.bf16.mxu0 %vm1594_vm0, %v1592_v1  ;;  %1416 = vmatprep.mubr.msk.bf16.mxu1 %vm1594_vm0, %v1592_v1 }
 0x180   :  { %v288_v60 = vpop.f32.mrb[0].mxu0  ;;  %v331_v61 = vpop.f32.mrb[0].mxu1 }
 0x181   :  { %v289_v62 = vadd.f32 %v288_v60, %v117_v57  ;;  %v290_v63 = vpop.f32.mrb[1].mxu0  ;;  %v1406_v0 = vpop.f32.mrb[1].mxu1  ;;  %v332_v7 = vadd.f32 %v331_v61, %v125_v59 }
 0x182   :  { %v291_v4 = vadd.f32 %v290_v63, %v121_v58  ;;  %v292_v5 = vpop.f32.mrb[2].mxu0  ;;  %v334_v6 = vpop.f32.mrb[2].mxu1 }
 0x183   :  { %v335_v8 = vadd.f32 %v334_v6, %v125_v59  ;;  %v294_v9 = vpop.f32.mrb[3].mxu0  ;;  %v1407_v10 = vpop.f32.mrb[3].mxu1  ;;  %v344_v11 = vsub.f32 0.0, %v289_v62  ;;  %v293_v17 = vadd.f32 %v292_v5, %v117_v57  ;;  %v342_v47 = vmul.f32 %v338_v29, %v289_v62 }
 0x184   :  { %386 = vrot.lane.b32.xlu0 %v291_v4, %s1595_s5  ;;  %v374_v15 = vsub.f32 0.0, %v291_v4  ;;  %v295_v18 = vadd.f32 %v294_v9, %v121_v58  ;;  %v372_v35 = vmul.f32 %v338_v29, %v291_v4  ;;  %v403_v59 = vand.u32 127, %v57_v36 }
 0x185   :  { %v399_v12 = vpack.c.bf16 %v335_v8, %v332_v7  ;;  %348 = vrot.lane.b32.xlu1 %v344_v11, %s1595_s5  ;;  %v345_v19 = vsub.f32 0.0, %v293_v17  ;;  %v343_v50 = vmul.f32 %v339_v30, %v293_v17 }
 0x186   :  { %v375_v20 = vsub.f32 0.0, %v295_v18  ;;  %v373_v37 = vmul.f32 %v339_v30, %v295_v18  ;;  %vm404_vm3 = vcmp.le.s32.totalorder %v403_v59, %v1748_v38 }
 0x187   :  { %v566_v13 = vrot.slane %v399_v12, 4  ;;  %v464_v14 = vsel %vm462_vm1, %v399_v12, 0 }
 0x188   :  { %1415 = vmatpush3.bf16.msra.mxu1 %v464_v14 }
 0x189   :  { %378 = vrot.lane.b32.xlu1 %v374_v15, %s1595_s5  ;;  %1426 = vmatprep.subr.bf16.mxu1 %v1592_v1  ;;  %v1773_v16 = vsel %vm462_vm1, %v566_v13, 0 }
 0x18d   :  { %388 = vrot.lane.b32.xlu1 %v295_v18, %s1595_s5 }
 0x191   :  { %350 = vrot.lane.b32.xlu1 %v345_v19, %s1595_s5 }
 0x195   :  { %380 = vrot.lane.b32.xlu1 %v375_v20, %s1595_s5  ;;  %v1488_v20 = vld [vmem:[%s2012_s6] sm:$0xff]  }
 0x199   :  { %356 = vrot.lane.b32.xlu1 %v289_v62, %s1595_s5 }
 0x19d   :  { %358 = vrot.lane.b32.xlu1 %v293_v17, %s1595_s5 }
 0x1f6   :  { %v387_v24 = vpop.permute.xlu0 %386 }
 0x1f7   :  { %v349_v21 = vpop.permute.xlu1 %348 }
 0x1fb   :  { %v379_v22 = vpop.permute.xlu1 %378 }
 0x1fc   :  { %v392_v28 = vsel %vm362_vm2, %v379_v22, %v387_v24  ;;  %v1490_v22 = vld [vmem:[%s2012_s6 + $0x10] sm:$0xff]   ;;  %v1492_v24 = vld [vmem:[%s2012_s6 + $0x20] sm:$0xff]  }
 0x1fd   :  { %v394_v32 = vmul.f32 %v392_v28, %v340_v27 }
 0x1ff   :  { %v389_v23 = vpop.permute.xlu1 %388  ;;  %v396_v40 = vadd.f32 %v394_v32, %v372_v35  ;;  %v1495_v35 = vld [vmem:[%s2012_s6 + $0x38] sm:$0xff]  }
 0x203   :  { %v351_v26 = vpop.permute.xlu1 %350 }
 0x207   :  { %v381_v33 = vpop.permute.xlu1 %380 }
 0x208   :  { %v393_v34 = vsel %vm362_vm2, %v381_v33, %v389_v23  ;;  %v1491_v23 = vld [vmem:[%s2012_s6 + $0x18] sm:$0xff]  }
 0x209   :  { %v395_v39 = vmul.f32 %v393_v34, %v341_v31  ;;  %v1493_v34 = vld [vmem:[%s2012_s6 + $0x28] sm:$0xff]  }
 0x20b   :  { %v397_v42 = vadd.f32 %v395_v39, %v373_v37  ;;  %v357_v43 = vpop.permute.xlu1 %356 }
 0x20c   :  { %v363_v44 = vsel %vm362_vm2, %v349_v21, %v357_v43  ;;  %v1489_v21 = vld [vmem:[%s2012_s6 + $0x8] sm:$0xff]  }
 0x20d   :  { %v398_v45 = vpack.c.bf16 %v397_v42, %v396_v40  ;;  %v365_v46 = vmul.f32 %v363_v44, %v340_v27 }
 0x20f   :  { %1409 = vmatpush3.bf16.xpose.msra.mxu0 %v398_v45  ;;  %v359_v48 = vpop.permute.xlu1 %358  ;;  %v367_v51 = vadd.f32 %v365_v46, %v342_v47  ;;  %v510_v57 = vrot.slane %v398_v45, 4 }
 0x210   :  { %v364_v49 = vsel %vm362_vm2, %v351_v26, %v359_v48  ;;  %1420 = vmatprep.subr.bf16.mxu0 %v1592_v1  ;;  %v1498_v48 = vld [vmem:[%s2013_s8 + $0x4] ss:$16 sps:$4 sm:$0xff]  }
 0x211   :  { %v366_v52 = vmul.f32 %v364_v49, %v341_v31  ;;  %v369_v54 = vmul.f32 0.088388346, %v367_v51  ;;  %v1499_v49 = vld [vmem:[%s2013_s8 + $0x8] ss:$16 sps:$4 sm:$0xff]   ;;  %v1504_v51 = vld [vmem:[%s2013_s8 + $0x24] ss:$16 sps:$4 sm:$0xff]  }
 0x213   :  { %v368_v53 = vadd.f32 %v366_v52, %v343_v50  ;;  %v1501_v50 = vld [vmem:[%s2013_s8 + $0xc] ss:$16 sps:$4 sm:$0xff]   ;;  %v1505_v52 = vld [vmem:[%s2013_s8 + $0x28] ss:$16 sps:$4 sm:$0xff]  }
 0x215   :  { %v370_v55 = vmul.f32 0.088388346, %v368_v53  ;;  %v1507_v53 = vld [vmem:[%s2013_s8 + $0x2c] ss:$16 sps:$4 sm:$0xff]  }
 0x217   :  { %v371_v56 = vpack.c.bf16 %v370_v55, %v369_v54  ;;  %v1508_v54 = vld [vmem:[%s2013_s8 + $0x40] ss:$16 sps:$4 sm:$0xff]   ;;  %v1510_v55 = vld [vmem:[%s2013_s8 + $0x44] ss:$16 sps:$4 sm:$0xff]  }
 0x219   :  { %1411 = vmatmul.mubr.bf16.vlgmr.msra.gmra.mrb[4].mxu0 %v371_v56  ;;  %v507_v58 = vrot.slane %v371_v56, 4  ;;  %v1511_v56 = vld [vmem:[%s2013_s8 + $0x48] ss:$16 sps:$4 sm:$0xff]  }
 0x21a   :  { %1421 = vmatpush3.bf16.xpose.msra.mxu0 %v510_v57  ;;  %1422 = vmatprep.mubr.msk.bf16.mxu0 %vm1594_vm0, %v1592_v1  ;;  %v1513_v57 = vld [vmem:[%s2013_s8 + $0x4c] ss:$16 sps:$4 sm:$0xff]  }
 0x21b   :  { %1432 = vmatprep.subr.bf16.mxu0 %v1592_v1 }
 0x221   :  { %1423 = vmatmul.mubr.bf16.vlgmr.msra.gmra.mrb[8].mxu0 %v507_v58 }
 0x222   :  { %1448 = vmatprep.mubr.msk.bf16.mxu0 %vm1594_vm0, %v1592_v1  ;;  %1433 = vmatpush3.bf16.msra.mxu0 %v1488_v20  ;;  %v1538_v20 = vld [vmem:[%s2013_s8 + $0xe0] ss:$16 sps:$4 sm:$0xff]  }
 0x223   :  { %1434 = vmatprep.subr.bf16.mxu0 %v1592_v1 }
 0x226   :  { %1435 = vmatpush3.bf16.msra.mxu0 %v1489_v21  ;;  %v1541_v21 = vld [vmem:[%s2013_s8 + $0xe8] ss:$16 sps:$4 sm:$0xff]  }
 0x227   :  { %1436 = vmatprep.subr.bf16.mxu0 %v1592_v1 }
 0x22a   :  { %1437 = vmatpush3.bf16.msra.mxu0 %v1490_v22 }
 0x22b   :  { %1438 = vmatprep.subr.bf16.mxu0 %v1592_v1 }
 0x22e   :  { %1439 = vmatpush3.bf16.msra.mxu0 %v1491_v23 }
 0x22f   :  { %1440 = vmatprep.subr.bf16.mxu0 %v1592_v1 }
 0x232   :  { %1441 = vmatpush3.bf16.msra.mxu0 %v1492_v24 }
 0x233   :  { %1442 = vmatprep.subr.bf16.mxu0 %v1592_v1 }
 0x236   :  { %1443 = vmatpush3.bf16.msra.mxu0 %v1493_v34 }
 0x237   :  { %1444 = vmatprep.subr.bf16.mxu0 %v1592_v1 }
 0x2ec   :  { %v439_v60 = vpop.f32.mrb[4].mxu0 }
 0x2ed   :  { %v445_v61 = vsel %vm404_vm3, %v439_v60, -inf  ;;  %v1412_v62 = vpop.f32.mrb[5].mxu0 }
 0x2ee   :  { %v442_v63 = vpop.f32.mrb[6].mxu0  ;;  %v447_v0 = vsel %vm446_vm4, %v445_v61, -inf }
 0x2ef   :  { %448 = vmax.xlane.f32.xlu1 %v447_v0  ;;  %v1413_v4 = vpop.f32.mrb[7].mxu0 }
 0x2f4   :  { %v546_v5 = vpop.f32.mrb[8].mxu0 }
 0x2f5   :  { %v552_v6 = vsel %vm404_vm3, %v546_v5, -inf  ;;  %v1424_v7 = vpop.f32.mrb[9].mxu0  ;;  %v1516_v5 = vld [vmem:[%s2013_s8 + $0x64] ss:$16 sps:$4 sm:$0xff]  }
 0x2f6   :  { %v549_v8 = vpop.f32.mrb[10].mxu0  ;;  %v553_v9 = vsel %vm446_vm4, %v552_v6, -inf  ;;  %v1520_v7 = vld [vmem:[%s2013_s8 + $0x80] ss:$16 sps:$4 sm:$0xff]  }
 0x2f7   :  { %554 = vmax.xlane.f32.xlu0 %v553_v9  ;;  %v1425_v10 = vpop.f32.mrb[11].mxu0  ;;  %v1522_v8 = vld [vmem:[%s2013_s8 + $0x84] ss:$16 sps:$4 sm:$0xff]   ;;  %v1523_v9 = vld [vmem:[%s2013_s8 + $0x88] ss:$16 sps:$4 sm:$0xff]  }
 0x2f8   :  { %v1525_v10 = vld [vmem:[%s2013_s8 + $0x8c] ss:$16 sps:$4 sm:$0xff]  }
 0x37c   :  { %v449_v36 = vpop.xlane.xlu1 %448 }
 0x37d   :  { %v450_v11 = vsub.f32 %v445_v61, %v449_v36  ;;  %v1528_v36 = vld [vmem:[%s2013_s8 + $0xa4] ss:$16 sps:$4 sm:$0xff]  }
 0x37f   :  { %v451_v38 = vmul.f32 1.442695, %v450_v11  ;;  %v1531_v11 = vld [vmem:[%s2013_s8 + $0xac] ss:$16 sps:$4 sm:$0xff]  }
 0x381   :  { %1564 = vpow2.f32 %v451_v38  ;;  %v1526_v38 = vld [vmem:[%s2013_s8 + $0xa0] ss:$16 sps:$4 sm:$0xff]  }
 0x384   :  { %v555_v12 = vpop.xlane.xlu0 %554 }
 0x385   :  { %v556_v13 = vsub.f32 %v552_v6, %v555_v12  ;;  %v1517_v6 = vld [vmem:[%s2013_s8 + $0x68] ss:$16 sps:$4 sm:$0xff]  }
 0x386   :  { %v1529_v12 = vld [vmem:[%s2013_s8 + $0xa8] ss:$16 sps:$4 sm:$0xff]  }
 0x387   :  { %v557_v14 = vmul.f32 1.442695, %v556_v13  ;;  %v1534_v13 = vld [vmem:[%s2013_s8 + $0xc4] ss:$16 sps:$4 sm:$0xff]  }
 0x389   :  { %1566 = vpow2.f32 %v557_v14  ;;  %v1537_v14 = vld [vmem:[%s2013_s8 + $0xcc] ss:$16 sps:$4 sm:$0xff]  }
 0x38b   :  { %v1565_v15 = vpop.eup %1564 }
 0x38c   :  { %v453_v17 = vsel %vm446_vm4, %v1565_v15, 0.0 }
 0x38d   :  { %454 = vadd.xlane.f32.xlu0 %v453_v17  ;;  %v1535_v17 = vld [vmem:[%s2013_s8 + $0xc8] ss:$16 sps:$4 sm:$0xff]  }
 0x393   :  { %v1567_v18 = vpop.eup %1566 }
 0x394   :  { %v559_v19 = vsel %vm446_vm4, %v1567_v18, 0.0 }
 0x395   :  { %560 = vadd.xlane.f32.xlu1 %v559_v19  ;;  %v1543_v19 = vld [vmem:[%s2013_s8 + $0xec] ss:$16 sps:$4 sm:$0xff]  }
 0x41a   :  { %v455_v26 = vpop.xlane.xlu0 %454 }
 0x41b   :  { %1568 = vrcp.f32 %v455_v26 }
 0x422   :  { %v561_v27 = vpop.xlane.xlu1 %560 }
 0x423   :  { %1570 = vrcp.f32 %v561_v27 }
 0x425   :  { %v1569_v28 = vpop.eup %1568 }
 0x426   :  { %v457_v29 = vmul.f32 %v1569_v28, %v1565_v15  ;;  %v1532_v15 = vld [vmem:[%s2013_s8 + $0xc0] ss:$16 sps:$4 sm:$0xff]  }
 0x428   :  { %v458_v30 = vpack.c.bf16 %v457_v29, %v457_v29  ;;  %v721_v29 = vld [vmem:[%s2014_s7] sm:$0x1] }
 0x42a   :  { %1417 = vmatmul.mubr.msk.bf16.vlgmr.msra.gmra.mrb[4].mxu1 %vm446_vm4, %v458_v30  ;;  %v736_v30 = vunpack.c.l.bf16 %v721_v29 }
 0x42b   :  { %1427 = vmatpush3.bf16.msra.mxu1 %v1773_v16  ;;  %1428 = vmatprep.mubr.msk.bf16.mxu1 %vm1594_vm0, %v1592_v1  ;;  %v1494_v16 = vld [vmem:[%s2012_s6 + $0x30] sm:$0xff]  }
 0x42c   :  { %1445 = vmatpush3.bf16.msra.mxu0 %v1494_v16  ;;  %936 = vmatprep.subr.bf16.mxu1 %v1498_v48  ;;  %v1553_v48 = vld [vmem:[%s2015_s9 + $0x20] sm:$0xff]  }
 0x42d   :  { %v1571_v31 = vpop.eup %1570  ;;  %1446 = vmatprep.subr.bf16.mxu0 %v1592_v1  ;;  %v1496_v1 = vld [vmem:[%s2013_s8] ss:$16 sps:$4 sm:$0xff]  }
 0x42e   :  { %v563_v32 = vmul.f32 %v1571_v31, %v1567_v18  ;;  %v1540_v18 = vld [vmem:[%s2013_s8 + $0xe4] ss:$16 sps:$4 sm:$0xff]  }
 0x430   :  { %v564_v33 = vpack.c.bf16 %v563_v32, %v563_v32  ;;  %1447 = vmatpush3.bf16.msra.mxu0 %v1495_v35 }
 0x431   :  { %979 = vmatprep.subr.bf16.mxu0 %v1501_v50  ;;  %v1555_v50 = vld [vmem:[%s2015_s9 + $0x28] sm:$0xff]  }
 0x432   :  { %1429 = vmatmul.mubr.msk.bf16.vlgmr.msra.gmra.mrb[8].mxu1 %vm446_vm4, %v564_v33  ;;  %v740_v33 = vrot.slane %v736_v30, %v1754_v41  ;;  %v1546_v41 = vld [vmem:[%s2015_s9 + $0x48] sm:$0xff]  }
 0x433   :  { %968 = vmatprep.mubr.bf16.mxu1 %v1593_v25  ;;  %937 = vmatpush1.bf16.msra.mxu1 %v1496_v1  ;;  %v1552_v1 = vld [vmem:[%s2015_s9 + $0x60] sm:$0xff]  }
 0x434   :  { %938 = vmatprep.subr.bf16.mxu1 %v1504_v51  ;;  %v1557_v51 = vld [vmem:[%s2015_s9 + $0x30] sm:$0xff]  }
 0x4fd   :  { %v500_v37 = vpop.f32.mrb[4].mxu1 }
 0x4fe   :  { %v1418_v39 = vpop.f32.mrb[5].mxu1 }
 0x4ff   :  { %v503_v40 = vpop.f32.mrb[6].mxu1 }
 0x500   :  { %v1419_v42 = vpop.f32.mrb[7].mxu1  ;;  %v1544_v40 = vld [vmem:[%s2015_s9 + $0x40] sm:$0xff]  }
 0x501   :  { %v1545_v42 = vld [vmem:[%s2015_s9] sm:$0xff]  }
 0x505   :  { %v607_v43 = vpop.f32.mrb[8].mxu1 }
 0x506   :  { %v613_v44 = vpack.c.bf16 %v607_v43, %v500_v37  ;;  %v1430_v45 = vpop.f32.mrb[9].mxu1  ;;  %v1547_v43 = vld [vmem:[%s2015_s9 + $0x8] sm:$0xff]  }
 0x507   :  { %v610_v46 = vpop.f32.mrb[10].mxu1  ;;  %v1549_v45 = vld [vmem:[%s2015_s9 + $0x10] sm:$0xff]  }
 0x508   :  { %v1431_v47 = vpop.f32.mrb[11].mxu1  ;;  %1449 = vmatmul.mubr.bf16.vlgmr.msra.gmra.mrb[12].mxu0 %v613_v44  ;;  %v1548_v44 = vld [vmem:[%s2015_s9 + $0x50] sm:$0xff]   ;;  %v1550_v46 = vld [vmem:[%s2015_s9 + $0x58] sm:$0xff]  }
 0x509   :  { %1011 = vmatprep.mubr.bf16.mxu0 %v1593_v25  ;;  %v1502_v25 = vld [vmem:[%s2013_s8 + $0x20] ss:$16 sps:$4 sm:$0xff]   ;;  %980 = vmatpush1.bf16.msra.mxu0 %v1499_v49  ;;  %v1551_v47 = vld [vmem:[%s2015_s9 + $0x18] sm:$0xff]   ;;  %v1554_v49 = vld [vmem:[%s2015_s9 + $0x68] sm:$0xff]  }
 0x50a   :  { %981 = vmatprep.subr.bf16.mxu0 %v1507_v53  ;;  %939 = vmatpush1.bf16.msra.mxu1 %v1502_v25  ;;  %v1556_v25 = vld [vmem:[%s2015_s9 + $0x70] sm:$0xff]   ;;  %v1559_v53 = vld [vmem:[%s2015_s9 + $0x38] sm:$0xff]  }
 0x50b   :  { %940 = vmatprep.subr.bf16.mxu1 %v1510_v55 }
 0x50d   :  { %982 = vmatpush1.bf16.msra.mxu0 %v1505_v52  ;;  %v1558_v52 = vld [vmem:[%s2015_s9 + $0x78] sm:$0xff]  }
 0x50e   :  { %983 = vmatprep.subr.bf16.mxu0 %v1513_v57  ;;  %941 = vmatpush1.bf16.msra.mxu1 %v1508_v54 }
 0x50f   :  { %942 = vmatprep.subr.bf16.mxu1 %v1516_v5 }
 0x511   :  { %984 = vmatpush1.bf16.msra.mxu0 %v1511_v56 }
 0x5db   :  { %v712_v58 = vpop.f32.mrb[12].mxu0 }
 0x5dc   :  { %v1878_v59 = vadd.f32 %v1655_v2, %v712_v58  ;;  %v1450_v60 = vpop.f32.mrb[13].mxu0  ;;  %v1519_v2 = vld [vmem:[%s2013_s8 + $0x6c] ss:$16 sps:$4 sm:$0xff]  }
 0x5dd   :  { %v715_v61 = vpop.f32.mrb[14].mxu0  ;;  %985 = vmatprep.subr.bf16.mxu0 %v1519_v2 }
 0x5de   :  { %v1881_v62 = vadd.f32 %v1657_v3, %v715_v61  ;;  %v1451_v63 = vpop.f32.mrb[15].mxu0  ;;  %v722_v0 = vmul.f32 %v1878_v59, %v1878_v59  ;;  %v1514_v3 = vld [vmem:[%s2013_s8 + $0x60] ss:$16 sps:$4 sm:$0xff]   ;;  %986 = vmatpush1.bf16.msra.mxu0 %v1517_v6 }
 0x5df   :  { %943 = vmatpush1.bf16.msra.mxu1 %v1514_v3  ;;  %987 = vmatprep.subr.bf16.mxu0 %v1525_v10 }
 0x5e0   :  { %724 = vadd.xlane.f32.xlu0 %v722_v0  ;;  %v723_v4 = vmul.f32 %v1881_v62, %v1881_v62  ;;  %944 = vmatprep.subr.bf16.mxu1 %v1522_v8 }
 0x5e2   :  { %726 = vadd.xlane.f32.xlu1 %v723_v4  ;;  %988 = vmatpush1.bf16.msra.mxu0 %v1523_v9 }
 0x5e3   :  { %945 = vmatpush1.bf16.msra.mxu1 %v1520_v7  ;;  %989 = vmatprep.subr.bf16.mxu0 %v1531_v11 }
 0x5e4   :  { %946 = vmatprep.subr.bf16.mxu1 %v1528_v36 }
 0x5e6   :  { %990 = vmatpush1.bf16.msra.mxu0 %v1529_v12 }
 0x5e7   :  { %947 = vmatpush1.bf16.msra.mxu1 %v1526_v38  ;;  %991 = vmatprep.subr.bf16.mxu0 %v1537_v14 }
 0x5e8   :  { %948 = vmatprep.subr.bf16.mxu1 %v1534_v13 }
 0x5ea   :  { %992 = vmatpush1.bf16.msra.mxu0 %v1535_v17 }
 0x5eb   :  { %949 = vmatpush1.bf16.msra.mxu1 %v1532_v15  ;;  %993 = vmatprep.subr.bf16.mxu0 %v1543_v19 }
 0x5ec   :  { %950 = vmatprep.subr.bf16.mxu1 %v1540_v18 }
 0x5ee   :  { %994 = vmatpush1.bf16.msra.mxu0 %v1541_v21 }
 0x5ef   :  { %951 = vmatpush1.bf16.msra.mxu1 %v1538_v20 }
 0x5f0   :  { %1366 = vmatprep.subr.bf16.mxu1 %v1544_v40 }
 0x66d   :  { %v725_v22 = vpop.xlane.xlu0 %724 }
 0x66e   :  { %v728_v23 = vmul.f32 0.0078125, %v725_v22 }
 0x66f   :  { %v727_v24 = vpop.xlane.xlu1 %726 }
 0x670   :  { %v730_v26 = vadd.f32 1e-06, %v728_v23  ;;  %v729_v27 = vmul.f32 0.0078125, %v727_v24 }
 0x672   :  { %1572 = vrsqrt.f32 %v730_v26  ;;  %v731_v28 = vadd.f32 1e-06, %v729_v27 }
 0x674   :  { %1574 = vrsqrt.f32 %v731_v28 }
 0x67c   :  { %v1573_v31 = vpop.eup %1572 }
 0x67d   :  { %v734_v32 = vmul.f32 %v1573_v31, %v1878_v59 }
 0x67e   :  { %v1575_v34 = vpop.eup %1574 }
 0x67f   :  { %v735_v16 = vmul.f32 %v1575_v34, %v1881_v62  ;;  %v741_v35 = vmul.f32 %v740_v33, %v734_v32 }
 0x681   :  { %v742_v37 = vmul.f32 %v740_v33, %v735_v16 }
 0x683   :  { %v743_v39 = vpack.c.bf16 %v742_v37, %v741_v35 }
 0x685   :  { %969 = vmatmul.mubr.bf16.vlgmr.msra.gmra.mrb[12].mxu1 %v743_v39  ;;  %1012 = vmatmul.mubr.bf16.vlgmr.msra.gmra.mrb[16].mxu0 %v743_v39 }
 0x686   :  { %1367 = vmatpush3.bf16.msra.mxu1 %v1545_v42 }
 0x687   :  { %1368 = vmatprep.subr.bf16.mxu1 %v1546_v41 }
 0x68a   :  { %1369 = vmatpush3.bf16.msra.mxu1 %v1547_v43 }
 0x68b   :  { %1370 = vmatprep.subr.bf16.mxu1 %v1548_v44 }
 0x68e   :  { %1371 = vmatpush3.bf16.msra.mxu1 %v1549_v45 }
 0x68f   :  { %1372 = vmatprep.subr.bf16.mxu1 %v1550_v46 }
 0x692   :  { %1373 = vmatpush3.bf16.msra.mxu1 %v1551_v47 }
 0x693   :  { %1374 = vmatprep.subr.bf16.mxu1 %v1552_v1 }
 0x696   :  { %1375 = vmatpush3.bf16.msra.mxu1 %v1553_v48 }
 0x697   :  { %1376 = vmatprep.subr.bf16.mxu1 %v1554_v49 }
 0x69a   :  { %1377 = vmatpush3.bf16.msra.mxu1 %v1555_v50 }
 0x69b   :  { %1378 = vmatprep.subr.bf16.mxu1 %v1556_v25 }
 0x69e   :  { %1379 = vmatpush3.bf16.msra.mxu1 %v1557_v51 }
 0x69f   :  { %1380 = vmatprep.subr.bf16.mxu1 %v1558_v52 }
 0x6a2   :  { %1381 = vmatpush3.bf16.msra.mxu1 %v1559_v53 }
 0x758   :  { %v970_v54 = vpop.f32.mrb[12].mxu1  ;;  %v1013_v55 = vpop.f32.mrb[16].mxu0 }
 0x759   :  { %v1307_v56 = vmul.f32 -1.442695, %v970_v54  ;;  %v972_v57 = vpop.f32.mrb[13].mxu1  ;;  %v1015_v58 = vpop.f32.mrb[17].mxu0 }
 0x75a   :  { %v1308_v60 = vmul.f32 -1.442695, %v972_v57  ;;  %v974_v61 = vpop.f32.mrb[14].mxu1  ;;  %v1017_v63 = vpop.f32.mrb[18].mxu0 }
 0x75b   :  { %1576 = vpow2.f32 %v1307_v56  ;;  %v1309_v0 = vmul.f32 -1.442695, %v974_v61  ;;  %v976_v4 = vpop.f32.mrb[15].mxu1  ;;  %v1019_v5 = vpop.f32.mrb[19].mxu0 }
 0x75c   :  { %1578 = vpow2.f32 %v1308_v60  ;;  %v1310_v2 = vmul.f32 -1.442695, %v976_v4 }
 0x75d   :  { %1580 = vpow2.f32 %v1309_v0 }
 0x75e   :  { %1582 = vpow2.f32 %v1310_v2 }
 0x765   :  { %v1577_v3 = vpop.eup %1576 }
 0x766   :  { %v1579_v6 = vpop.eup %1578  ;;  %v1034_v7 = vadd.f32 1.0, %v1577_v3 }
 0x767   :  { %v1581_v8 = vpop.eup %1580  ;;  %v1035_v9 = vadd.f32 1.0, %v1579_v6 }
 0x768   :  { %v1583_v10 = vpop.eup %1582  ;;  %1584 = vrcp.f32 %v1034_v7  ;;  %v1036_v36 = vadd.f32 1.0, %v1581_v8 }
 0x769   :  { %1586 = vrcp.f32 %v1035_v9  ;;  %v1037_v11 = vadd.f32 1.0, %v1583_v10 }
 0x76a   :  { %1588 = vrcp.f32 %v1036_v36 }
 0x76b   :  { %1590 = vrcp.f32 %v1037_v11 }
 0x772   :  { %v1585_v38 = vpop.eup %1584 }
 0x773   :  { %v1587_v12 = vpop.eup %1586  ;;  %v1046_v13 = vmul.f32 %v1585_v38, %v970_v54 }
 0x774   :  { %v1589_v14 = vpop.eup %1588  ;;  %v1047_v15 = vmul.f32 %v1587_v12, %v972_v57 }
 0x775   :  { %v1591_v17 = vpop.eup %1590  ;;  %v1050_v18 = vmul.f32 %v1046_v13, %v1013_v55  ;;  %v1048_v19 = vmul.f32 %v1589_v14, %v974_v61 }
 0x776   :  { %v1051_v20 = vmul.f32 %v1047_v15, %v1015_v58  ;;  %v1049_v21 = vmul.f32 %v1591_v17, %v976_v4 }
 0x777   :  { %v1052_v22 = vmul.f32 %v1048_v19, %v1017_v63 }
 0x778   :  { %v1053_v23 = vmul.f32 %v1049_v21, %v1019_v5 }
 0x779   :  { %v1054_v24 = vpack.c.bf16 %v1052_v22, %v1050_v18 }
 0x77a   :  { %v1055_v26 = vpack.c.bf16 %v1053_v23, %v1051_v20 }
 0x77c   :  { %1216 = vmatprep.mubr.bf16.mxu1 %v1055_v26 }
 0x77d   :  { %1217 = vmatmul.mubr.bf16.vlgmr.msra.gmra.mrb[16].mxu1 %v1054_v24 }
 0x850   :  { %v1382_v27 = vpop.f32.mrb[16].mxu1 }
 0x851   :  { %v1383_v28 = vpop.f32.mrb[17].mxu1 }
 0x852   :  { %v1384_v29 = vadd.f32 %v1383_v28, %v1382_v27  ;;  %v1385_v30 = vpop.f32.mrb[18].mxu1 }
 0x853   :  { %v1386_v31 = vpop.f32.mrb[19].mxu1 }
 0x854   :  { %v1387_v32 = vadd.f32 %v1386_v31, %v1385_v30  ;;  %v1225_v33 = vadd.f32 %v1384_v29, %v1878_v59 }
 0x856   :  { %v1226_v34 = vadd.f32 %v1387_v32, %v1881_v62 }
 0x858   :  { %v1338_v16 = vpack.c.bf16 %v1226_v34, %v1225_v33 }
 0x85a   :  { %1339 = vst [vmem:[%s2016_s10] sm:$0xff] %v1338_v16  }

// kernel: forward.3
= control target key start
LH: loop header
LB: loop body
LE: loop exit
PB: predicated region body
PF: predicated region fallthrough
CT: control target
= control target key end

     0   :  { %15 = vsyncpa [#allocation3], 0  ;;  %s2011_s0 = inlined_call_operand.vmem [shape: bf16[16,128], index: 0, kind: input, shape index: {}]   ;;  %s2012_s1 = inlined_call_operand.vmem [shape: f32[16,128], index: 1, kind: input, shape index: {}]   ;;  %s2013_s2 = inlined_call_operand.vmem [shape: f32[16,128], index: 2, kind: input, shape index: {}]   ;;  %s2014_s3 = inlined_call_operand.vmem [shape: bf16[1,128], index: 3, kind: input, shape index: {}]   ;;  %s2015_s4 = inlined_call_operand.vmem [shape: bf16[128,384], index: 4, kind: input, shape index: {}]   ;;  %s2016_s5 = inlined_call_operand.vmem [shape: bf16[1,384], index: 5, kind: input, shape index: {}]   ;;  %s2017_s6 = inlined_call_operand.hbm [shape: bf16[128,128], index: 6, kind: input, shape index: {}]   ;;  %s2018_s7 = inlined_call_operand.vmem [shape: bf16[1,128], index: 7, kind: input, shape index: {}]   ;;  %s2019_s8 = inlined_call_operand.hbm [shape: bf16[128,512], index: 8, kind: input, shape index: {}]   ;;  %s2020_s9 = inlined_call_operand.hbm [shape: bf16[256,128], index: 9, kind: input, shape index: {}]   ;;  %s2021_s10 = inlined_call_operand.vmem [shape: bf16[16,128], index: 10, kind: output, shape index: {}]  }
   0x1   :  { %16 = vsyncpa [#allocation5], 0  ;;  %s1711_s13 = smov [#allocation4]   ;;  %s1641_s17 = scalar_lea.hbm %s2019_s8, 4096 }
   0x2   :  { %s48_s14 = sshll.u32 %s1711_s13, 4  ;;  %p1642_p0 = scmp.ne.s32.totalorder %s2019_s8, %s1641_s17  ;;  %s49_s14 = int_to_ptr.vmem [resolvable:$true] %s48_s14 }
   0x3   :  { %p1645_p1 = scmp.lt.u32.totalorder %s1641_s17, %s2019_s8 }
   0x5   :  { %p1647_p2 = pnand %p1645_p1, %p1642_p0 }
   0x7   :  { %1650 = shalt.err (!%p1647_p2)
}
   0x8   :  { %s1651_s22 = scalar_lea.vmem %s49_s14, 4096  ;;  %p1656_p4 = scmp.lt.s32.totalorder %s49_s14, %s49_s14 }
   0x9   :  { %p1652_p3 = scmp.ne.s32.totalorder %s49_s14, %s1651_s22  ;;  %p1657_p5 = scmp.lt.s32.totalorder %s1651_s22, %s1651_s22 }
   0xb   :  { %p1658_p6 = por %p1657_p5, %p1656_p4 }
   0xd   :  { %p1659_p7 = pnand %p1658_p6, %p1652_p3 }
   0xf   :  { %1662 = shalt.err (!%p1659_p7)
}
  0x10   :  { %s1712_s23 = smov 256   ;;  %s1713_s24 = smov 16  }
  0x11   :  { %54 = dma.hbm_to_vmem [thread:$0]  %s2019_s8, 4096, %s49_s14, [#allocation5], %s1712_s23, %s1712_s23, %s1713_s24  }
  0x12   :  { %s1714_s27 = smov [#allocation2]   ;;  %s1663_s11 = scalar_lea.hbm %s2017_s6, 1024 }
  0x13   :  { %s34_s28 = sshll.u32 %s1714_s27, 4  ;;  %p1664_p8 = scmp.ne.s32.totalorder %s2017_s6, %s1663_s11  ;;  %s35_s28 = int_to_ptr.vmem [resolvable:$true] %s34_s28 }
  0x14   :  { %p1667_p9 = scmp.lt.u32.totalorder %s1663_s11, %s2017_s6 }
  0x16   :  { %p1669_p10 = pnand %p1667_p9, %p1664_p8 }
  0x18   :  { %1672 = shalt.err (!%p1669_p10)
}
  0x19   :  { %s1673_s17 = scalar_lea.vmem %s35_s28, 1024  ;;  %p1678_p12 = scmp.lt.s32.totalorder %s35_s28, %s35_s28 }
  0x1a   :  { %p1674_p11 = scmp.ne.s32.totalorder %s35_s28, %s1673_s17  ;;  %p1679_p13 = scmp.lt.s32.totalorder %s1673_s17, %s1673_s17 }
  0x1c   :  { %p1680_p0 = por %p1679_p13, %p1678_p12 }
  0x1e   :  { %p1681_p1 = pnand %p1680_p0, %p1674_p11 }
  0x20   :  { %1684 = shalt.err (!%p1681_p1)
}
  0x21   :  { %s1715_s8 = smov 64   ;;  %s1716_s14 = smov 4  }
  0x22   :  { %40 = dma.hbm_to_vmem [thread:$0]  %s2017_s6, 1024, %s35_s28, [#allocation3], %s1715_s8, %s1715_s8, %s1716_s14  }
  0x23   :  { %s1717_s20 = smov [#allocation6]   ;;  %s1685_s24 = scalar_lea.hbm %s2020_s9, 2048 }
  0x24   :  { %s60_s21 = sshll.u32 %s1717_s20, 4  ;;  %p1686_p2 = scmp.ne.s32.totalorder %s2020_s9, %s1685_s24  ;;  %s61_s21 = int_to_ptr.vmem [resolvable:$true] %s60_s21 }
  0x25   :  { %p1689_p3 = scmp.lt.u32.totalorder %s1685_s24, %s2020_s9 }
  0x27   :  { %p1691_p4 = pnand %p1689_p3, %p1686_p2 }
  0x29   :  { %1694 = shalt.err (!%p1691_p4)
}
  0x2a   :  { %s1695_s30 = scalar_lea.vmem %s61_s21, 2048  ;;  %p1700_p6 = scmp.lt.s32.totalorder %s61_s21, %s61_s21 }
  0x2b   :  { %p1696_p5 = scmp.ne.s32.totalorder %s61_s21, %s1695_s30  ;;  %p1701_p7 = scmp.lt.s32.totalorder %s1695_s30, %s1695_s30 }
  0x2d   :  { %p1702_p8 = por %p1701_p7, %p1700_p6 }
  0x2f   :  { %p1703_p9 = pnand %p1702_p8, %p1696_p5 }
  0x31   :  { %1706 = shalt.err (!%p1703_p9)
}
  0x32   :  { %66 = dma.hbm_to_vmem [thread:$0]  %s2020_s9, 2048, %s61_s21, [#allocation5], %s1715_s8, %s1715_s8, %s1716_s14  }
  0x33   :  { %1707 = dma.done.wait [#allocation3], 1024  }
  0x34   :  { %1708 = vsyncadd [#allocation3], 4294966272 }
  0x35   :  { %1709 = dma.done.wait [#allocation5], 6144  }
  0x36   :  { %1710 = vsyncadd [#allocation5], 4294961152  ;;  %v1718_v0 = vmov 0.0   ;;  %v1375_v1 = vld [vmem:[%s2011_s0] sm:$0xff]   ;;  %v1508_v6 = vld [vmem:[%s2015_s4 + $0x8] ss:$12 sps:$4 sm:$0xff]   ;;  %v98_v36 = vlaneseq }
  0x37   :  { %1431 = vmatprep.subr.bf16.mxu1 %v1718_v0  ;;  %v1820_v2 = vunpack.c.l.bf16 %v1375_v1  ;;  %v1822_v3 = vunpack.c.h.bf16 %v1375_v1  ;;  %v1505_v4 = vld [vmem:[%s2015_s4 + $0x4] ss:$12 sps:$4 sm:$0xff]   ;;  %v1507_v5 = vld [vmem:[%s2015_s4] ss:$12 sps:$4 sm:$0xff]   ;;  %v1509_v8 = vld [vmem:[%s2015_s4 + $0x1c] ss:$12 sps:$4 sm:$0xff]  }
  0x38   :  { %295 = vmatprep.subr.bf16.mxu0 %v1505_v4  ;;  %v1511_v9 = vld [vmem:[%s2015_s4 + $0x18] ss:$12 sps:$4 sm:$0xff]   ;;  %1432 = vmatpush3.bf16.msra.mxu1 %v1508_v6  ;;  %v1512_v10 = vld [vmem:[%s2015_s4 + $0x20] ss:$12 sps:$4 sm:$0xff]   ;;  %v1515_v13 = vld [vmem:[%s2015_s4 + $0x30] ss:$12 sps:$4 sm:$0xff]  }
  0x39   :  { %v82_v7 = vmul.f32 %v1820_v2, %v1820_v2  ;;  %296 = vmatpush1.bf16.msra.mxu0 %v1507_v5  ;;  %v83_v11 = vmul.f32 %v1822_v3, %v1822_v3  ;;  %1433 = vmatprep.subr.bf16.mxu1 %v1718_v0  ;;  %v1513_v12 = vld [vmem:[%s2015_s4 + $0x34] ss:$12 sps:$4 sm:$0xff]   ;;  %v1516_v14 = vld [vmem:[%s2015_s4 + $0x38] ss:$12 sps:$4 sm:$0xff]   ;;  %v1520_v17 = vld [vmem:[%s2015_s4 + $0x50] ss:$12 sps:$4 sm:$0xff]  }
  0x3a   :  { %297 = vmatprep.subr.bf16.mxu0 %v1509_v8  ;;  %v1517_v15 = vld [vmem:[%s2015_s4 + $0x4c] ss:$12 sps:$4 sm:$0xff]   ;;  %v1519_v16 = vld [vmem:[%s2015_s4 + $0x48] ss:$12 sps:$4 sm:$0xff]   ;;  %v1521_v18 = vld [vmem:[%s2015_s4 + $0x64] ss:$12 sps:$4 sm:$0xff]  }
  0x3b   :  { %84 = vadd.xlane.f32.xlu0 %v82_v7  ;;  %v1523_v19 = vld [vmem:[%s2015_s4 + $0x60] ss:$12 sps:$4 sm:$0xff]   ;;  %v1524_v20 = vld [vmem:[%s2015_s4 + $0x68] ss:$12 sps:$4 sm:$0xff]   ;;  %v1527_v22 = vld [vmem:[%s2015_s4 + $0x78] ss:$12 sps:$4 sm:$0xff]  }
  0x3c   :  { %1434 = vmatpush3.bf16.msra.mxu1 %v1512_v10  ;;  %v1525_v21 = vld [vmem:[%s2015_s4 + $0x7c] ss:$12 sps:$4 sm:$0xff]   ;;  %v1528_v23 = vld [vmem:[%s2015_s4 + $0x80] ss:$12 sps:$4 sm:$0xff]   ;;  %v1532_v26 = vld [vmem:[%s2015_s4 + $0x98] ss:$12 sps:$4 sm:$0xff]  }
  0x3d   :  { %298 = vmatpush1.bf16.msra.mxu0 %v1511_v9  ;;  %1435 = vmatprep.subr.bf16.mxu1 %v1718_v0  ;;  %v1529_v24 = vld [vmem:[%s2015_s4 + $0x94] ss:$12 sps:$4 sm:$0xff]   ;;  %v1531_v25 = vld [vmem:[%s2015_s4 + $0x90] ss:$12 sps:$4 sm:$0xff]   ;;  %v1719_v27 = vmov 0   ;;  %vm1720_vm0 = vmmov 0  }
  0x3e   :  { %299 = vmatprep.subr.bf16.mxu0 %v1513_v12  ;;  %327 = vmatprep.mubr.bf16.mxu0 %v1719_v27  ;;  %v1533_v28 = vld [vmem:[%s2015_s4 + $0xac] ss:$12 sps:$4 sm:$0xff]   ;;  %v1535_v29 = vld [vmem:[%s2015_s4 + $0xa8] ss:$12 sps:$4 sm:$0xff]   ;;  %v1536_v30 = vld [vmem:[%s2015_s4 + $0xb0] ss:$12 sps:$4 sm:$0xff]  }
  0x3f   :  { %86 = vadd.xlane.f32.xlu0 %v83_v11  ;;  %1447 = vmatprep.mubr.msk.bf16.mxu1 %vm1720_vm0, %v1718_v0  ;;  %v1913_v38 = vshrl.u32 %v98_v36, 7  ;;  %v81_v39 = vld [vmem:[%s2014_s3] sm:$0x1]  ;;  %vm503_vm1 = vcmask 1043456   ;;  %vm403_vm2 = vcmask 523264   ;;  %vm487_vm4 = vcmask 64512  }
  0x40   :  { %1436 = vmatpush3.bf16.msra.mxu1 %v1516_v14  ;;  %v97_v40 = vunpack.c.l.bf16 %v81_v39  ;;  %v137_v50 = vld [vmem:[%s2016_s5] sm:$0x7] }
  0x41   :  { %300 = vmatpush1.bf16.msra.mxu0 %v1515_v13  ;;  %1437 = vmatprep.subr.bf16.mxu1 %v1718_v0  ;;  %v1919_v41 = vsub.s32 0, %v1913_v38  ;;  %v138_v51 = vunpack.c.l.bf16 %v137_v50  ;;  %v146_v52 = vsub.s32 2, %v1913_v38  ;;  %v150_v53 = vsub.s32 4, %v1913_v38 }
  0x42   :  { %301 = vmatprep.subr.bf16.mxu0 %v1517_v15 }
  0x43   :  { %v101_v44 = vrot.slane %v97_v40, %v1919_v41  ;;  %v143_v54 = vrot.slane %v138_v51, %v1919_v41  ;;  %v147_v55 = vrot.slane %v138_v51, %v146_v52  ;;  %v151_v56 = vrot.slane %v138_v51, %v150_v53 }
  0x44   :  { %1438 = vmatpush3.bf16.msra.mxu1 %v1520_v17 }
  0x45   :  { %302 = vmatpush1.bf16.msra.mxu0 %v1519_v16  ;;  %1439 = vmatprep.subr.bf16.mxu1 %v1718_v0  ;;  %v158_v57 = vrot.slane %v143_v54, %v1919_v41  ;;  %v162_v58 = vrot.slane %v147_v55, %v1919_v41  ;;  %v166_v59 = vrot.slane %v151_v56, %v1919_v41 }
  0x46   :  { %303 = vmatprep.subr.bf16.mxu0 %v1521_v18 }
  0x48   :  { %1440 = vmatpush3.bf16.msra.mxu1 %v1524_v20 }
  0x49   :  { %304 = vmatpush1.bf16.msra.mxu0 %v1523_v19  ;;  %1441 = vmatprep.subr.bf16.mxu1 %v1718_v0 }
  0x4a   :  { %305 = vmatprep.subr.bf16.mxu0 %v1525_v21 }
  0x4c   :  { %1442 = vmatpush3.bf16.msra.mxu1 %v1528_v23 }
  0x4d   :  { %306 = vmatpush1.bf16.msra.mxu0 %v1527_v22  ;;  %1443 = vmatprep.subr.bf16.mxu1 %v1718_v0 }
  0x4e   :  { %307 = vmatprep.subr.bf16.mxu0 %v1529_v24 }
  0x50   :  { %1444 = vmatpush3.bf16.msra.mxu1 %v1532_v26  ;;  %v381_v26 = vld [vmem:[%s2013_s2] sm:$0xff] }
  0x51   :  { %308 = vmatpush1.bf16.msra.mxu0 %v1531_v25  ;;  %1445 = vmatprep.subr.bf16.mxu1 %v1718_v0 }
  0x52   :  { %309 = vmatprep.subr.bf16.mxu0 %v1533_v28 }
  0x54   :  { %1446 = vmatpush3.bf16.msra.mxu1 %v1536_v30  ;;  %v380_v30 = vld [vmem:[%s2012_s1 + $0x8] sm:$0xff] }
  0x55   :  { %310 = vmatpush1.bf16.msra.mxu0 %v1535_v29  ;;  %1457 = vmatprep.subr.bf16.mxu1 %v1718_v0  ;;  %v379_v29 = vld [vmem:[%s2012_s1] sm:$0xff] }
  0x56   :  { %1451 = vmatprep.subr.bf16.mxu0 %v1718_v0 }
  0xc8   :  { %v85_v31 = vpop.xlane.xlu0 %84 }
  0xc9   :  { %v89_v32 = vmul.f32 0.0078125, %v85_v31  ;;  %v382_v31 = vld [vmem:[%s2013_s2 + $0x8] sm:$0xff] }
  0xcb   :  { %v91_v33 = vadd.f32 1e-06, %v89_v32 }
  0xcc   :  { %v87_v34 = vpop.xlane.xlu0 %86 }
  0xcd   :  { %1609 = vrsqrt.f32 %v91_v33  ;;  %v90_v35 = vmul.f32 0.0078125, %v87_v34 }
  0xcf   :  { %v92_v37 = vadd.f32 1e-06, %v90_v35 }
  0xd1   :  { %1611 = vrsqrt.f32 %v92_v37 }
  0xd7   :  { %v1610_v42 = vpop.eup %1609 }
  0xd8   :  { %v95_v43 = vmul.f32 %v1610_v42, %v1820_v2 }
  0xda   :  { %v102_v47 = vmul.f32 %v101_v44, %v95_v43 }
  0xdb   :  { %v1612_v45 = vpop.eup %1611 }
  0xdc   :  { %v96_v46 = vmul.f32 %v1612_v45, %v1822_v3 }
  0xde   :  { %v103_v48 = vmul.f32 %v101_v44, %v96_v46 }
  0xe0   :  { %v104_v49 = vpack.c.bf16 %v103_v48, %v102_v47 }
  0xe2   :  { %328 = vmatmul.mubr.bf16.vlgmr.msra.gmra.mrb[0].mxu0 %v104_v49  ;;  %1448 = vmatmul.mubr.bf16.vlgmr.msra.gmra.mrb[0].mxu1 %v104_v49 }
  0xe3   :  { %1453 = vmatprep.mubr.msk.bf16.mxu0 %vm1720_vm0, %v1718_v0  ;;  %1459 = vmatprep.mubr.msk.bf16.mxu1 %vm1720_vm0, %v1718_v0 }
 0x1b5   :  { %v329_v60 = vpop.f32.mrb[0].mxu0  ;;  %v372_v61 = vpop.f32.mrb[0].mxu1 }
 0x1b6   :  { %v330_v62 = vadd.f32 %v329_v60, %v158_v57  ;;  %v331_v63 = vpop.f32.mrb[1].mxu0  ;;  %v1449_v1 = vpop.f32.mrb[1].mxu1  ;;  %v373_v7 = vadd.f32 %v372_v61, %v166_v59 }
 0x1b7   :  { %v332_v4 = vadd.f32 %v331_v63, %v162_v58  ;;  %v333_v5 = vpop.f32.mrb[2].mxu0  ;;  %v375_v6 = vpop.f32.mrb[2].mxu1 }
 0x1b8   :  { %v376_v8 = vadd.f32 %v375_v6, %v166_v59  ;;  %v335_v9 = vpop.f32.mrb[3].mxu0  ;;  %v1450_v10 = vpop.f32.mrb[3].mxu1  ;;  %v385_v11 = vsub.f32 0.0, %v330_v62  ;;  %v334_v17 = vadd.f32 %v333_v5, %v158_v57  ;;  %v383_v47 = vmul.f32 %v379_v29, %v330_v62 }
 0x1b9   :  { %427 = vrot.lane.b32.xlu0 %v332_v4, %s1715_s8  ;;  %v415_v15 = vsub.f32 0.0, %v332_v4  ;;  %v336_v18 = vadd.f32 %v335_v9, %v162_v58  ;;  %v413_v35 = vmul.f32 %v379_v29, %v332_v4  ;;  %v444_v59 = vand.u32 127, %v98_v36 }
 0x1ba   :  { %v440_v12 = vpack.c.bf16 %v376_v8, %v373_v7  ;;  %389 = vrot.lane.b32.xlu1 %v385_v11, %s1715_s8  ;;  %v386_v19 = vsub.f32 0.0, %v334_v17  ;;  %v384_v50 = vmul.f32 %v380_v30, %v334_v17 }
 0x1bb   :  { %v416_v20 = vsub.f32 0.0, %v336_v18  ;;  %v414_v37 = vmul.f32 %v380_v30, %v336_v18  ;;  %vm445_vm3 = vcmp.le.s32.totalorder %v444_v59, %v1913_v38 }
 0x1bc   :  { %v607_v13 = vrot.slane %v440_v12, 4  ;;  %v505_v14 = vsel %vm503_vm1, %v440_v12, 0 }
 0x1bd   :  { %1458 = vmatpush3.bf16.msra.mxu1 %v505_v14 }
 0x1be   :  { %419 = vrot.lane.b32.xlu1 %v415_v15, %s1715_s8  ;;  %1469 = vmatprep.subr.bf16.mxu1 %v1718_v0  ;;  %v1941_v16 = vsel %vm503_vm1, %v607_v13, 0 }
 0x1c2   :  { %429 = vrot.lane.b32.xlu1 %v336_v18, %s1715_s8 }
 0x1c6   :  { %391 = vrot.lane.b32.xlu1 %v386_v19, %s1715_s8 }
 0x1ca   :  { %421 = vrot.lane.b32.xlu1 %v416_v20, %s1715_s8  ;;  %v1537_v20 = vld [vmem:[#allocation2] sm:$0xff]  }
 0x1ce   :  { %397 = vrot.lane.b32.xlu1 %v330_v62, %s1715_s8 }
 0x1d2   :  { %399 = vrot.lane.b32.xlu1 %v334_v17, %s1715_s8 }
 0x22b   :  { %v428_v24 = vpop.permute.xlu0 %427 }
 0x22c   :  { %v390_v21 = vpop.permute.xlu1 %389 }
 0x230   :  { %v420_v22 = vpop.permute.xlu1 %419 }
 0x231   :  { %v433_v28 = vsel %vm403_vm2, %v420_v22, %v428_v24  ;;  %v1539_v22 = vld [vmem:[#allocation2 + $0x10] sm:$0xff]   ;;  %v1541_v24 = vld [vmem:[#allocation2 + $0x20] sm:$0xff]  }
 0x232   :  { %v435_v32 = vmul.f32 %v433_v28, %v381_v26 }
 0x234   :  { %v430_v23 = vpop.permute.xlu1 %429  ;;  %v437_v40 = vadd.f32 %v435_v32, %v413_v35  ;;  %v1543_v35 = vld [vmem:[#allocation2 + $0x30] sm:$0xff]  }
 0x238   :  { %v392_v25 = vpop.permute.xlu1 %391 }
 0x23c   :  { %v422_v33 = vpop.permute.xlu1 %421 }
 0x23d   :  { %v434_v34 = vsel %vm403_vm2, %v422_v33, %v430_v23  ;;  %v1540_v23 = vld [vmem:[#allocation2 + $0x18] sm:$0xff]  }
 0x23e   :  { %v436_v39 = vmul.f32 %v434_v34, %v382_v31  ;;  %v1542_v34 = vld [vmem:[#allocation2 + $0x28] sm:$0xff]  }
 0x240   :  { %v438_v42 = vadd.f32 %v436_v39, %v414_v37  ;;  %v398_v43 = vpop.permute.xlu1 %397  ;;  %v1544_v37 = vld [vmem:[#allocation2 + $0x38] sm:$0xff]  }
 0x241   :  { %v404_v44 = vsel %vm403_vm2, %v390_v21, %v398_v43  ;;  %v1538_v21 = vld [vmem:[#allocation2 + $0x8] sm:$0xff]  }
 0x242   :  { %v439_v45 = vpack.c.bf16 %v438_v42, %v437_v40  ;;  %v406_v46 = vmul.f32 %v404_v44, %v381_v26 }
 0x244   :  { %1452 = vmatpush3.bf16.xpose.msra.mxu0 %v439_v45  ;;  %v400_v48 = vpop.permute.xlu1 %399  ;;  %v408_v51 = vadd.f32 %v406_v46, %v383_v47  ;;  %v551_v57 = vrot.slane %v439_v45, 4 }
 0x245   :  { %v405_v49 = vsel %vm403_vm2, %v392_v25, %v400_v48  ;;  %1463 = vmatprep.subr.bf16.mxu0 %v1718_v0  ;;  %v1545_v48 = vld [vmem:[#allocation4] ss:$16 sps:$4 sm:$0xff]  }
 0x246   :  { %v407_v52 = vmul.f32 %v405_v49, %v382_v31  ;;  %v410_v54 = vmul.f32 0.088388346, %v408_v51  ;;  %v1547_v49 = vld [vmem:[#allocation4 + $0x4] ss:$16 sps:$4 sm:$0xff]   ;;  %v1550_v51 = vld [vmem:[#allocation4 + $0xc] ss:$16 sps:$4 sm:$0xff]  }
 0x248   :  { %v409_v53 = vadd.f32 %v407_v52, %v384_v50  ;;  %v1548_v50 = vld [vmem:[#allocation4 + $0x8] ss:$16 sps:$4 sm:$0xff]   ;;  %v1553_v52 = vld [vmem:[#allocation4 + $0x24] ss:$16 sps:$4 sm:$0xff]  }
 0x24a   :  { %v411_v55 = vmul.f32 0.088388346, %v409_v53  ;;  %v1551_v53 = vld [vmem:[#allocation4 + $0x20] ss:$16 sps:$4 sm:$0xff]  }
 0x24c   :  { %v412_v56 = vpack.c.bf16 %v411_v55, %v410_v54  ;;  %v1554_v54 = vld [vmem:[#allocation4 + $0x28] ss:$16 sps:$4 sm:$0xff]   ;;  %v1559_v55 = vld [vmem:[#allocation4 + $0x44] ss:$16 sps:$4 sm:$0xff]  }
 0x24e   :  { %1454 = vmatmul.mubr.bf16.vlgmr.msra.gmra.mrb[4].mxu0 %v412_v56  ;;  %v548_v58 = vrot.slane %v412_v56, 4  ;;  %v1562_v56 = vld [vmem:[#allocation4 + $0x4c] ss:$16 sps:$4 sm:$0xff]  }
 0x24f   :  { %1464 = vmatpush3.bf16.xpose.msra.mxu0 %v551_v57  ;;  %1465 = vmatprep.mubr.msk.bf16.mxu0 %vm1720_vm0, %v1718_v0  ;;  %v1557_v57 = vld [vmem:[#allocation4 + $0x40] ss:$16 sps:$4 sm:$0xff]  }
 0x250   :  { %1475 = vmatprep.subr.bf16.mxu0 %v1718_v0 }
 0x256   :  { %1466 = vmatmul.mubr.bf16.vlgmr.msra.gmra.mrb[8].mxu0 %v548_v58 }
 0x257   :  { %1491 = vmatprep.mubr.msk.bf16.mxu0 %vm1720_vm0, %v1718_v0  ;;  %1476 = vmatpush3.bf16.msra.mxu0 %v1537_v20  ;;  %v1587_v20 = vld [vmem:[#allocation4 + $0xe0] ss:$16 sps:$4 sm:$0xff]  }
 0x258   :  { %1477 = vmatprep.subr.bf16.mxu0 %v1718_v0 }
 0x25b   :  { %1478 = vmatpush3.bf16.msra.mxu0 %v1538_v21  ;;  %v1590_v21 = vld [vmem:[#allocation4 + $0xe8] ss:$16 sps:$4 sm:$0xff]  }
 0x25c   :  { %1479 = vmatprep.subr.bf16.mxu0 %v1718_v0 }
 0x25f   :  { %1480 = vmatpush3.bf16.msra.mxu0 %v1539_v22 }
 0x260   :  { %1481 = vmatprep.subr.bf16.mxu0 %v1718_v0 }
 0x263   :  { %1482 = vmatpush3.bf16.msra.mxu0 %v1540_v23 }
 0x264   :  { %1483 = vmatprep.subr.bf16.mxu0 %v1718_v0 }
 0x267   :  { %1484 = vmatpush3.bf16.msra.mxu0 %v1541_v24 }
 0x268   :  { %1485 = vmatprep.subr.bf16.mxu0 %v1718_v0 }
 0x26b   :  { %1486 = vmatpush3.bf16.msra.mxu0 %v1542_v34 }
 0x26c   :  { %1487 = vmatprep.subr.bf16.mxu0 %v1718_v0 }
 0x26f   :  { %1488 = vmatpush3.bf16.msra.mxu0 %v1543_v35 }
 0x270   :  { %1489 = vmatprep.subr.bf16.mxu0 %v1718_v0 }
 0x273   :  { %1490 = vmatpush3.bf16.msra.mxu0 %v1544_v37 }
 0x274   :  { %1020 = vmatprep.subr.bf16.mxu0 %v1550_v51  ;;  %v1604_v51 = vld [vmem:[#allocation6 + $0x28] sm:$0xff]  }
 0x321   :  { %v480_v60 = vpop.f32.mrb[4].mxu0 }
 0x322   :  { %v486_v61 = vsel %vm445_vm3, %v480_v60, -inf  ;;  %v1455_v62 = vpop.f32.mrb[5].mxu0 }
 0x323   :  { %v483_v63 = vpop.f32.mrb[6].mxu0  ;;  %v488_v1 = vsel %vm487_vm4, %v486_v61, -inf }
 0x324   :  { %489 = vmax.xlane.f32.xlu1 %v488_v1  ;;  %v1456_v4 = vpop.f32.mrb[7].mxu0 }
 0x329   :  { %v587_v5 = vpop.f32.mrb[8].mxu0 }
 0x32a   :  { %v593_v6 = vsel %vm445_vm3, %v587_v5, -inf  ;;  %v1467_v7 = vpop.f32.mrb[9].mxu0  ;;  %v1565_v5 = vld [vmem:[#allocation4 + $0x64] ss:$16 sps:$4 sm:$0xff]  }
 0x32b   :  { %v590_v8 = vpop.f32.mrb[10].mxu0  ;;  %v594_v9 = vsel %vm487_vm4, %v593_v6, -inf  ;;  %v1563_v7 = vld [vmem:[#allocation4 + $0x60] ss:$16 sps:$4 sm:$0xff]  }
 0x32c   :  { %595 = vmax.xlane.f32.xlu0 %v594_v9  ;;  %v1468_v10 = vpop.f32.mrb[11].mxu0  ;;  %v1566_v8 = vld [vmem:[#allocation4 + $0x68] ss:$16 sps:$4 sm:$0xff]  }
 0x32d   :  { %v1572_v9 = vld [vmem:[#allocation4 + $0x88] ss:$16 sps:$4 sm:$0xff]   ;;  %v1574_v10 = vld [vmem:[#allocation4 + $0x8c] ss:$16 sps:$4 sm:$0xff]  }
 0x3b1   :  { %v490_v36 = vpop.xlane.xlu1 %489 }
 0x3b2   :  { %v491_v11 = vsub.f32 %v486_v61, %v490_v36  ;;  %v1577_v36 = vld [vmem:[#allocation4 + $0xa4] ss:$16 sps:$4 sm:$0xff]  }
 0x3b4   :  { %v492_v38 = vmul.f32 1.442695, %v491_v11  ;;  %v1580_v11 = vld [vmem:[#allocation4 + $0xac] ss:$16 sps:$4 sm:$0xff]  }
 0x3b6   :  { %1613 = vpow2.f32 %v492_v38  ;;  %v1575_v38 = vld [vmem:[#allocation4 + $0xa0] ss:$16 sps:$4 sm:$0xff]  }
 0x3b9   :  { %v596_v12 = vpop.xlane.xlu0 %595 }
 0x3ba   :  { %v597_v13 = vsub.f32 %v593_v6, %v596_v12  ;;  %v1568_v6 = vld [vmem:[#allocation4 + $0x6c] ss:$16 sps:$4 sm:$0xff]   ;;  %v1578_v12 = vld [vmem:[#allocation4 + $0xa8] ss:$16 sps:$4 sm:$0xff]  }
 0x3bc   :  { %v598_v14 = vmul.f32 1.442695, %v597_v13  ;;  %v1583_v13 = vld [vmem:[#allocation4 + $0xc4] ss:$16 sps:$4 sm:$0xff]  }
 0x3be   :  { %1615 = vpow2.f32 %v598_v14  ;;  %v1586_v14 = vld [vmem:[#allocation4 + $0xcc] ss:$16 sps:$4 sm:$0xff]  }
 0x3c0   :  { %v1614_v15 = vpop.eup %1613 }
 0x3c1   :  { %v494_v17 = vsel %vm487_vm4, %v1614_v15, 0.0 }
 0x3c2   :  { %495 = vadd.xlane.f32.xlu0 %v494_v17  ;;  %v1584_v17 = vld [vmem:[#allocation4 + $0xc8] ss:$16 sps:$4 sm:$0xff]  }
 0x3c8   :  { %v1616_v18 = vpop.eup %1615 }
 0x3c9   :  { %v600_v19 = vsel %vm487_vm4, %v1616_v18, 0.0 }
 0x3ca   :  { %601 = vadd.xlane.f32.xlu1 %v600_v19  ;;  %v1592_v19 = vld [vmem:[#allocation4 + $0xec] ss:$16 sps:$4 sm:$0xff]  }
 0x44f   :  { %v496_v25 = vpop.xlane.xlu0 %495 }
 0x450   :  { %1617 = vrcp.f32 %v496_v25 }
 0x457   :  { %v602_v26 = vpop.xlane.xlu1 %601 }
 0x458   :  { %1619 = vrcp.f32 %v602_v26 }
 0x45a   :  { %v1618_v28 = vpop.eup %1617 }
 0x45b   :  { %v498_v29 = vmul.f32 %v1618_v28, %v1614_v15  ;;  %v1581_v15 = vld [vmem:[#allocation4 + $0xc0] ss:$16 sps:$4 sm:$0xff]  }
 0x45d   :  { %v499_v30 = vpack.c.bf16 %v498_v29, %v498_v29  ;;  %v762_v29 = vld [vmem:[%s2018_s7] sm:$0x1] }
 0x45f   :  { %1460 = vmatmul.mubr.msk.bf16.vlgmr.msra.gmra.mrb[4].mxu1 %vm487_vm4, %v499_v30  ;;  %v777_v30 = vunpack.c.l.bf16 %v762_v29 }
 0x460   :  { %1470 = vmatpush3.bf16.msra.mxu1 %v1941_v16  ;;  %1471 = vmatprep.mubr.msk.bf16.mxu1 %vm1720_vm0, %v1718_v0  ;;  %v1556_v0 = vld [vmem:[#allocation4 + $0x2c] ss:$16 sps:$4 sm:$0xff]  }
 0x461   :  { %977 = vmatprep.subr.bf16.mxu1 %v1547_v49  ;;  %v1602_v49 = vld [vmem:[#allocation6 + $0x20] sm:$0xff]  }
 0x462   :  { %v1620_v31 = vpop.eup %1619 }
 0x463   :  { %v604_v32 = vmul.f32 %v1620_v31, %v1616_v18  ;;  %v1589_v18 = vld [vmem:[#allocation4 + $0xe4] ss:$16 sps:$4 sm:$0xff]  }
 0x465   :  { %v605_v33 = vpack.c.bf16 %v604_v32, %v604_v32 }
 0x467   :  { %1472 = vmatmul.mubr.msk.bf16.vlgmr.msra.gmra.mrb[8].mxu1 %vm487_vm4, %v605_v33  ;;  %v781_v33 = vrot.slane %v777_v30, %v1919_v41  ;;  %v1599_v41 = vld [vmem:[#allocation6 + $0x58] sm:$0xff]  }
 0x468   :  { %1009 = vmatprep.mubr.bf16.mxu1 %v1719_v27  ;;  %978 = vmatpush1.bf16.msra.mxu1 %v1545_v48  ;;  %v1601_v48 = vld [vmem:[#allocation6 + $0x60] sm:$0xff]  }
 0x469   :  { %979 = vmatprep.subr.bf16.mxu1 %v1553_v52  ;;  %v1605_v52 = vld [vmem:[#allocation6 + $0x70] sm:$0xff]  }
 0x46c   :  { %980 = vmatpush1.bf16.msra.mxu1 %v1551_v53  ;;  %v1607_v53 = vld [vmem:[#allocation6 + $0x78] sm:$0xff]  }
 0x46d   :  { %981 = vmatprep.subr.bf16.mxu1 %v1559_v55 }
 0x470   :  { %982 = vmatpush1.bf16.msra.mxu1 %v1557_v57 }
 0x471   :  { %983 = vmatprep.subr.bf16.mxu1 %v1565_v5 }
 0x474   :  { %984 = vmatpush1.bf16.msra.mxu1 %v1563_v7 }
 0x532   :  { %v541_v16 = vpop.f32.mrb[4].mxu1 }
 0x533   :  { %v1461_v39 = vpop.f32.mrb[5].mxu1 }
 0x534   :  { %v544_v40 = vpop.f32.mrb[6].mxu1 }
 0x535   :  { %v1462_v42 = vpop.f32.mrb[7].mxu1  ;;  %v1593_v40 = vld [vmem:[#allocation6 + $0x40] sm:$0xff]  }
 0x536   :  { %v1594_v42 = vld [vmem:[#allocation6] sm:$0xff]  }
 0x53a   :  { %v648_v43 = vpop.f32.mrb[8].mxu1 }
 0x53b   :  { %v654_v44 = vpack.c.bf16 %v648_v43, %v541_v16  ;;  %v1473_v45 = vpop.f32.mrb[9].mxu1  ;;  %v1595_v43 = vld [vmem:[#allocation6 + $0x48] sm:$0xff]  }
 0x53c   :  { %v651_v46 = vpop.f32.mrb[10].mxu1  ;;  %v1597_v45 = vld [vmem:[#allocation6 + $0x50] sm:$0xff]  }
 0x53d   :  { %v1474_v47 = vpop.f32.mrb[11].mxu1  ;;  %1492 = vmatmul.mubr.bf16.vlgmr.msra.gmra.mrb[12].mxu0 %v654_v44  ;;  %v1596_v44 = vld [vmem:[#allocation6 + $0x8] sm:$0xff]   ;;  %v1598_v46 = vld [vmem:[#allocation6 + $0x10] sm:$0xff]  }
 0x53e   :  { %1052 = vmatprep.mubr.bf16.mxu0 %v1719_v27  ;;  %1021 = vmatpush1.bf16.msra.mxu0 %v1548_v50  ;;  %v1560_v27 = vld [vmem:[#allocation4 + $0x48] ss:$16 sps:$4 sm:$0xff]  }
 0x53f   :  { %1022 = vmatprep.subr.bf16.mxu0 %v1556_v0  ;;  %v1600_v47 = vld [vmem:[#allocation6 + $0x18] sm:$0xff]   ;;  %v1603_v50 = vld [vmem:[#allocation6 + $0x68] sm:$0xff]   ;;  %v1606_v0 = vld [vmem:[#allocation6 + $0x30] sm:$0xff]  }
 0x542   :  { %1023 = vmatpush1.bf16.msra.mxu0 %v1554_v54  ;;  %v1608_v54 = vld [vmem:[#allocation6 + $0x38] sm:$0xff]  }
 0x543   :  { %1024 = vmatprep.subr.bf16.mxu0 %v1562_v56 }
 0x546   :  { %1025 = vmatpush1.bf16.msra.mxu0 %v1560_v27 }
 0x547   :  { %1026 = vmatprep.subr.bf16.mxu0 %v1568_v6 }
 0x54a   :  { %1027 = vmatpush1.bf16.msra.mxu0 %v1566_v8 }
 0x54b   :  { %1028 = vmatprep.subr.bf16.mxu0 %v1574_v10 }
 0x54e   :  { %1029 = vmatpush1.bf16.msra.mxu0 %v1572_v9 }
 0x54f   :  { %1030 = vmatprep.subr.bf16.mxu0 %v1580_v11 }
 0x552   :  { %1031 = vmatpush1.bf16.msra.mxu0 %v1578_v12 }
 0x553   :  { %1032 = vmatprep.subr.bf16.mxu0 %v1586_v14 }
 0x556   :  { %1033 = vmatpush1.bf16.msra.mxu0 %v1584_v17 }
 0x557   :  { %1034 = vmatprep.subr.bf16.mxu0 %v1592_v19 }
 0x55a   :  { %1035 = vmatpush1.bf16.msra.mxu0 %v1590_v21 }
 0x610   :  { %v753_v58 = vpop.f32.mrb[12].mxu0 }
 0x611   :  { %v1991_v59 = vadd.f32 %v1820_v2, %v753_v58  ;;  %v1493_v60 = vpop.f32.mrb[13].mxu0  ;;  %v1569_v2 = vld [vmem:[#allocation4 + $0x80] ss:$16 sps:$4 sm:$0xff]  }
 0x612   :  { %v756_v61 = vpop.f32.mrb[14].mxu0 }
 0x613   :  { %v1994_v62 = vadd.f32 %v1822_v3, %v756_v61  ;;  %v1494_v63 = vpop.f32.mrb[15].mxu0  ;;  %v763_v1 = vmul.f32 %v1991_v59, %v1991_v59  ;;  %v1571_v3 = vld [vmem:[#allocation4 + $0x84] ss:$16 sps:$4 sm:$0xff]  }
 0x614   :  { %985 = vmatprep.subr.bf16.mxu1 %v1571_v3 }
 0x615   :  { %765 = vadd.xlane.f32.xlu0 %v763_v1  ;;  %v764_v4 = vmul.f32 %v1994_v62, %v1994_v62  ;;  %986 = vmatpush1.bf16.msra.mxu1 %v1569_v2 }
 0x616   :  { %987 = vmatprep.subr.bf16.mxu1 %v1577_v36 }
 0x617   :  { %767 = vadd.xlane.f32.xlu1 %v764_v4 }
 0x619   :  { %988 = vmatpush1.bf16.msra.mxu1 %v1575_v38 }
 0x61a   :  { %989 = vmatprep.subr.bf16.mxu1 %v1583_v13 }
 0x61d   :  { %990 = vmatpush1.bf16.msra.mxu1 %v1581_v15 }
 0x61e   :  { %991 = vmatprep.subr.bf16.mxu1 %v1589_v18 }
 0x621   :  { %992 = vmatpush1.bf16.msra.mxu1 %v1587_v20 }
 0x622   :  { %1409 = vmatprep.subr.bf16.mxu1 %v1593_v40 }
 0x6a2   :  { %v766_v22 = vpop.xlane.xlu0 %765 }
 0x6a3   :  { %v769_v23 = vmul.f32 0.0078125, %v766_v22 }
 0x6a4   :  { %v768_v24 = vpop.xlane.xlu1 %767 }
 0x6a5   :  { %v771_v25 = vadd.f32 1e-06, %v769_v23  ;;  %v770_v26 = vmul.f32 0.0078125, %v768_v24 }
 0x6a7   :  { %1621 = vrsqrt.f32 %v771_v25  ;;  %v772_v28 = vadd.f32 1e-06, %v770_v26 }
 0x6a9   :  { %1623 = vrsqrt.f32 %v772_v28 }
 0x6b1   :  { %v1622_v31 = vpop.eup %1621 }
 0x6b2   :  { %v775_v32 = vmul.f32 %v1622_v31, %v1991_v59 }
 0x6b3   :  { %v1624_v34 = vpop.eup %1623 }
 0x6b4   :  { %v776_v35 = vmul.f32 %v1624_v34, %v1994_v62  ;;  %v782_v37 = vmul.f32 %v781_v33, %v775_v32 }
 0x6b6   :  { %v783_v16 = vmul.f32 %v781_v33, %v776_v35 }
 0x6b8   :  { %v784_v39 = vpack.c.bf16 %v783_v16, %v782_v37 }
 0x6ba   :  { %1010 = vmatmul.mubr.bf16.vlgmr.msra.gmra.mrb[12].mxu1 %v784_v39  ;;  %1053 = vmatmul.mubr.bf16.vlgmr.msra.gmra.mrb[16].mxu0 %v784_v39 }
 0x6bb   :  { %1410 = vmatpush3.bf16.msra.mxu1 %v1594_v42 }
 0x6bc   :  { %1411 = vmatprep.subr.bf16.mxu1 %v1595_v43 }
 0x6bf   :  { %1412 = vmatpush3.bf16.msra.mxu1 %v1596_v44 }
 0x6c0   :  { %1413 = vmatprep.subr.bf16.mxu1 %v1597_v45 }
 0x6c3   :  { %1414 = vmatpush3.bf16.msra.mxu1 %v1598_v46 }
 0x6c4   :  { %1415 = vmatprep.subr.bf16.mxu1 %v1599_v41 }
 0x6c7   :  { %1416 = vmatpush3.bf16.msra.mxu1 %v1600_v47 }
 0x6c8   :  { %1417 = vmatprep.subr.bf16.mxu1 %v1601_v48 }
 0x6cb   :  { %1418 = vmatpush3.bf16.msra.mxu1 %v1602_v49 }
 0x6cc   :  { %1419 = vmatprep.subr.bf16.mxu1 %v1603_v50 }
 0x6cf   :  { %1420 = vmatpush3.bf16.msra.mxu1 %v1604_v51 }
 0x6d0   :  { %1421 = vmatprep.subr.bf16.mxu1 %v1605_v52 }
 0x6d3   :  { %1422 = vmatpush3.bf16.msra.mxu1 %v1606_v0 }
 0x6d4   :  { %1423 = vmatprep.subr.bf16.mxu1 %v1607_v53 }
 0x6d7   :  { %1424 = vmatpush3.bf16.msra.mxu1 %v1608_v54 }
 0x78d   :  { %v1011_v55 = vpop.f32.mrb[12].mxu1  ;;  %v1054_v56 = vpop.f32.mrb[16].mxu0 }
 0x78e   :  { %v1350_v57 = vmul.f32 -1.442695, %v1011_v55  ;;  %v1013_v27 = vpop.f32.mrb[13].mxu1  ;;  %v1056_v58 = vpop.f32.mrb[17].mxu0 }
 0x78f   :  { %v1351_v60 = vmul.f32 -1.442695, %v1013_v27  ;;  %v1015_v61 = vpop.f32.mrb[14].mxu1  ;;  %v1058_v63 = vpop.f32.mrb[18].mxu0 }
 0x790   :  { %1625 = vpow2.f32 %v1350_v57  ;;  %v1352_v1 = vmul.f32 -1.442695, %v1015_v61  ;;  %v1017_v4 = vpop.f32.mrb[15].mxu1  ;;  %v1060_v5 = vpop.f32.mrb[19].mxu0 }
 0x791   :  { %1627 = vpow2.f32 %v1351_v60  ;;  %v1353_v6 = vmul.f32 -1.442695, %v1017_v4 }
 0x792   :  { %1629 = vpow2.f32 %v1352_v1 }
 0x793   :  { %1631 = vpow2.f32 %v1353_v6 }
 0x79a   :  { %v1626_v7 = vpop.eup %1625 }
 0x79b   :  { %v1628_v8 = vpop.eup %1627  ;;  %v1075_v2 = vadd.f32 1.0, %v1626_v7 }
 0x79c   :  { %v1630_v3 = vpop.eup %1629  ;;  %v1076_v9 = vadd.f32 1.0, %v1628_v8 }
 0x79d   :  { %v1632_v10 = vpop.eup %1631  ;;  %1633 = vrcp.f32 %v1075_v2  ;;  %v1077_v36 = vadd.f32 1.0, %v1630_v3 }
 0x79e   :  { %1635 = vrcp.f32 %v1076_v9  ;;  %v1078_v11 = vadd.f32 1.0, %v1632_v10 }
 0x79f   :  { %1637 = vrcp.f32 %v1077_v36 }
 0x7a0   :  { %1639 = vrcp.f32 %v1078_v11 }
 0x7a7   :  { %v1634_v38 = vpop.eup %1633 }
 0x7a8   :  { %v1636_v12 = vpop.eup %1635  ;;  %v1087_v13 = vmul.f32 %v1634_v38, %v1011_v55 }
 0x7a9   :  { %v1638_v14 = vpop.eup %1637  ;;  %v1088_v15 = vmul.f32 %v1636_v12, %v1013_v27 }
 0x7aa   :  { %v1640_v17 = vpop.eup %1639  ;;  %v1091_v18 = vmul.f32 %v1087_v13, %v1054_v56  ;;  %v1089_v19 = vmul.f32 %v1638_v14, %v1015_v61 }
 0x7ab   :  { %v1092_v20 = vmul.f32 %v1088_v15, %v1056_v58  ;;  %v1090_v21 = vmul.f32 %v1640_v17, %v1017_v4 }
 0x7ac   :  { %v1093_v22 = vmul.f32 %v1089_v19, %v1058_v63 }
 0x7ad   :  { %v1094_v23 = vmul.f32 %v1090_v21, %v1060_v5 }
 0x7ae   :  { %v1095_v24 = vpack.c.bf16 %v1093_v22, %v1091_v18 }
 0x7af   :  { %v1096_v25 = vpack.c.bf16 %v1094_v23, %v1092_v20 }
 0x7b1   :  { %1257 = vmatprep.mubr.bf16.mxu1 %v1096_v25 }
 0x7b2   :  { %1258 = vmatmul.mubr.bf16.vlgmr.msra.gmra.mrb[16].mxu1 %v1095_v24 }
 0x885   :  { %v1425_v26 = vpop.f32.mrb[16].mxu1 }
 0x886   :  { %v1426_v28 = vpop.f32.mrb[17].mxu1 }
 0x887   :  { %v1427_v29 = vadd.f32 %v1426_v28, %v1425_v26  ;;  %v1428_v30 = vpop.f32.mrb[18].mxu1 }
 0x888   :  { %v1429_v31 = vpop.f32.mrb[19].mxu1 }
 0x889   :  { %v1430_v32 = vadd.f32 %v1429_v31, %v1428_v30  ;;  %v1266_v33 = vadd.f32 %v1427_v29, %v1991_v59 }
 0x88b   :  { %v1267_v34 = vadd.f32 %v1430_v32, %v1994_v62 }
 0x88d   :  { %v1381_v35 = vpack.c.bf16 %v1267_v34, %v1266_v33 }
 0x88f   :  { %1382 = vst [vmem:[%s2021_s10] sm:$0xff] %v1381_v35  }
 0x890   :  { %1282 = vsyncpa [#allocation3], 1 }
 0x891   :  { %1283 = vsyncpa [#allocation5], 1 }

</bundles_post_ra>
